<compile_context>
chip_gen: v7x
topology: tpu7x:2x2x1
jax: 0.10.0
libtpu: 0.0.40
codegen_flags: <defaults>
</compile_context>

<pallas_src>
import functools

import jax
import jax.numpy as jnp
from jax.experimental import pallas as pl
from jax.experimental.pallas import tpu as pltpu

_LANE = 128
_SUBLANE = 8


def _round_up(x, m):
    return (x + m - 1) // m * m


def _decoder_kernel(h0_ref, c0_ref, tok_ref, emb_ref, wx_ref, wh_ref, b_ref,
                    wout_ref, bout_ref, logits_ref, h_out_ref, c_out_ref,
                    *, hidden_pad, num_layers, batch, batch_pad):
    Hp = hidden_pad

    # In-kernel embedding gather: relu and lane-padding are already folded into
    # the table, so one dynamic leading-dim load per (valid) batch row.
    rows = [emb_ref[tok_ref[bi]] for bi in range(batch)]          # each (1, Hp)
    if batch_pad > batch:
        rows.append(jnp.zeros((batch_pad - batch, Hp), jnp.float32))
    x = jnp.concatenate(rows, axis=0)                             # (Bp, Hp)

    for layer in range(num_layers):                               # small static loop
        h = h0_ref[layer]                                         # (Bp, Hp)
        c = c0_ref[layer]                                         # (Bp, Hp)
        # gates = x @ Wx + h @ Wh + b   (PyTorch gate order i|f|g|o, each block
        # padded to Hp lanes; i/f/o columns pre-scaled by 0.5 for the tanh fold)
        gates = (jnp.dot(x, wx_ref[layer], preferred_element_type=jnp.float32)
                 + jnp.dot(h, wh_ref[layer], preferred_element_type=jnp.float32)
                 + b_ref[layer])                                  # (Bp, 4*Hp)
        th = jnp.tanh(gates)                                      # one EUP pass
        i = 0.5 * (th[:, 0 * Hp:1 * Hp] + 1.0)                    # sigmoid(z) = 0.5*(tanh(z/2)+1)
        f = 0.5 * (th[:, 1 * Hp:2 * Hp] + 1.0)
        g = th[:, 2 * Hp:3 * Hp]
        o = 0.5 * (th[:, 3 * Hp:4 * Hp] + 1.0)
        c_new = f * c + i * g
        h_new = o * jnp.tanh(c_new)
        h_out_ref[layer] = h_new                                  # lane-dense store
        c_out_ref[layer] = c_new
        x = h_new                                                 # input to next layer

    # self.out(output[0, :]) -> (Bp, Op): lane-dense, unmasked store
    logits_ref[...] = (jnp.dot(x, wout_ref[...], preferred_element_type=jnp.float32)
                       + bout_ref[...])


def prepare_params(params):
    """One-time re-layout of PyTorch-style parameters for the kernel."""
    emb, w_ih, w_hh, b_ih, b_hh, w_out, b_out = params
    L, four_h, H = w_ih.shape
    O = w_out.shape[0]
    Hp = _round_up(H, _LANE)
    Op = _round_up(O, _LANE)
    # sigmoid -> tanh fold: scale i/f/o gate columns by 0.5 (g unscaled)
    gate_scale = jnp.array([0.5, 0.5, 1.0, 0.5], jnp.float32)

    def prep_w(w):  # (L, 4H, H) -> (L, Hp, 4*Hp): transpose + gate-block pad + scale
        w_t = jnp.transpose(w, (0, 2, 1)).astype(jnp.float32)     # (L, H, 4H)
        w4 = w_t.reshape(L, H, 4, H) * gate_scale[None, None, :, None]
        w4 = jnp.pad(w4, ((0, 0), (0, Hp - H), (0, 0), (0, Hp - H)))
        return w4.reshape(L, Hp, 4 * Hp)

    wx = prep_w(w_ih)
    wh = prep_w(w_hh)
    b4 = (b_ih + b_hh).astype(jnp.float32).reshape(L, 4, H) * gate_scale[None, :, None]
    b4 = jnp.pad(b4, ((0, 0), (0, 0), (0, Hp - H)))
    b = b4.reshape(L, 1, 4 * Hp)

    # relu folded into the table (relu(E)[tok] == relu(E[tok])); lanes padded;
    # (V, 1, Hp) layout so each row is a dynamically indexable leading-dim block.
    emb_relu = jnp.maximum(emb.astype(jnp.float32), 0.0)
    emb_relu = jnp.pad(emb_relu, ((0, 0), (0, Hp - H)))[:, None, :]

    wout = jnp.pad(w_out.T.astype(jnp.float32), ((0, Hp - H), (0, Op - O)))  # (Hp, Op)
    bout = jnp.pad(b_out.astype(jnp.float32), (0, Op - O))[None, :]          # (1, Op)
    return {"emb": emb_relu, "wx": wx, "wh": wh, "b": b, "wout": wout, "bout": bout}


def prepare_state(h0, c0):
    """One-time padding of (L, B, H) state to (L, B_pad, H_pad); padded entries zero."""
    L, B, H = h0.shape
    Hp = _round_up(H, _LANE)
    Bp = _round_up(B, _SUBLANE)
    pad = ((0, 0), (0, Bp - B), (0, Hp - H))
    return (jnp.pad(h0.astype(jnp.float32), pad),
            jnp.pad(c0.astype(jnp.float32), pad))


@functools.partial(jax.jit, donate_argnums=(1,))
def seq_decoder_step(tokens, state, prepared):
    """Pallas-backed forward of SeqDecoderLSTM (single decode step).

    tokens:   (B,) int32 token ids
    state:    (h0p, c0p), each (L, B_pad, H_pad) float32 (from prepare_state /
              previous step) -- stays padded, buffers are aliased/donated
    prepared: output of prepare_params
    returns:  (padded logits (B_pad, O_pad), (h_new, c_new) padded)
    """
    h0p, c0p = state
    L, Bp, Hp = h0p.shape
    B = tokens.shape[0]
    Op = prepared["wout"].shape[1]

    kernel = functools.partial(_decoder_kernel, hidden_pad=Hp, num_layers=L,
                               batch=B, batch_pad=Bp)
    vmem = pl.BlockSpec(memory_space=pltpu.MemorySpace.VMEM)
    smem = pl.BlockSpec(memory_space=pltpu.MemorySpace.SMEM)

    logits, h_new, c_new = pl.pallas_call(
        kernel,
        out_shape=(jax.ShapeDtypeStruct((Bp, Op), jnp.float32),
                   jax.ShapeDtypeStruct((L, Bp, Hp), jnp.float32),
                   jax.ShapeDtypeStruct((L, Bp, Hp), jnp.float32)),
        in_specs=[vmem, vmem, smem, vmem, vmem, vmem, vmem, vmem, vmem],
        out_specs=(vmem, vmem, vmem),
        input_output_aliases={0: 1, 1: 2},   # h0p -> h_new, c0p -> c_new (P8)
    )(h0p, c0p, tokens, prepared["emb"], prepared["wx"], prepared["wh"],
      prepared["b"], prepared["wout"], prepared["bout"])

    return logits, (h_new, c_new)


def _reference_forward(tokens, hidden_cell, params):
    """Pure-JAX reference matching the PyTorch semantics."""
    emb, w_ih, w_hh, b_ih, b_hh, w_out, b_out = params
    h0, c0 = hidden_cell
    L, B, H = h0.shape
    x = jnp.maximum(emb[tokens], 0.0)
    h_out, c_out = [], []
    for layer in range(L):
        gates = x @ w_ih[layer].T + h0[layer] @ w_hh[layer].T + b_ih[layer] + b_hh[layer]
        i = jax.nn.sigmoid(gates[:, 0 * H:1 * H])
        f = jax.nn.sigmoid(gates[:, 1 * H:2 * H])
        g = jnp.tanh(gates[:, 2 * H:3 * H])
        o = jax.nn.sigmoid(gates[:, 3 * H:4 * H])
        c_new = f * c0[layer] + i * g
        h_new = o * jnp.tanh(c_new)
        h_out.append(h_new)
        c_out.append(c_new)
        x = h_new
    logits = x @ w_out.T + b_out
    return logits, (jnp.stack(h_out), jnp.stack(c_out))


def init_params(key, hidden_size, output_size, num_layers):
    """Deterministic parameter init mimicking PyTorch default init shapes."""
    H, O, L = hidden_size, output_size, num_layers
    k_emb, k_ih, k_hh, k_bih, k_bhh, k_wo, k_bo = jax.random.split(key, 7)
    bound = 1.0 / jnp.sqrt(H)
    emb = jax.random.normal(k_emb, (O, H), jnp.float32)
    w_ih = jax.random.uniform(k_ih, (L, 4 * H, H), jnp.float32, -bound, bound)
    w_hh = jax.random.uniform(k_hh, (L, 4 * H, H), jnp.float32, -bound, bound)
    b_ih = jax.random.uniform(k_bih, (L, 4 * H), jnp.float32, -bound, bound)
    b_hh = jax.random.uniform(k_bhh, (L, 4 * H), jnp.float32, -bound, bound)
    w_out = jax.random.uniform(k_wo, (O, H), jnp.float32, -bound, bound)
    b_out = jax.random.uniform(k_bo, (O,), jnp.float32, -bound, bound)
    return (emb, w_ih, w_hh, b_ih, b_hh, w_out, b_out)


if __name__ == "__main__":
    hidden_size = 32
    output_size = 64
    batch_size = 4
    num_layers = 2

    key = jax.random.PRNGKey(0)
    k_params, k_tok, k_h, k_c = jax.random.split(key, 4)

    params = init_params(k_params, hidden_size, output_size, num_layers)
    tokens = jax.random.randint(k_tok, (batch_size,), 0, output_size, jnp.int32)
    h0 = jax.random.uniform(k_h, (num_layers, batch_size, hidden_size), jnp.float32)
    c0 = jax.random.uniform(k_c, (num_layers, batch_size, hidden_size), jnp.float32)

    # One-time re-layout (hoisted out of the per-step path).
    prepared = jax.tree_util.tree_map(jax.block_until_ready, prepare_params(params))
    state = prepare_state(h0, c0)   # padded once; stays padded across the decode loop

    logits_pad, state = seq_decoder_step(tokens, state, prepared)
    jax.block_until_ready((logits_pad, state))

    # Padding sliced off once, after the (single-step) decode loop.
    logits = logits_pad[:batch_size, :output_size]
    h_new = state[0][:, :batch_size, :hidden_size]
    c_new = state[1][:, :batch_size, :hidden_size]

    ref_logits, (ref_h, ref_c) = _reference_forward(tokens, (h0, c0), params)
    assert logits.shape == (batch_size, output_size)
    assert h_new.shape == (num_layers, batch_size, hidden_size)
    assert c_new.shape == (num_layers, batch_size, hidden_size)
    assert jnp.allclose(logits, ref_logits, atol=5e-5, rtol=5e-5)
    assert jnp.allclose(h_new, ref_h, atol=5e-5, rtol=5e-5)
    assert jnp.allclose(c_new, ref_c, atol=5e-5, rtol=5e-5)

    print("KERNEL_OK")
</pallas_src>

<mosaic_0001>
module attributes {stable_mosaic.version = 11 : i64} {
  func.func @_decoder_kernel(%arg0: memref<2x8x128xf32, #tpu.memory_space<vmem>>, %arg1: memref<2x8x128xf32, #tpu.memory_space<vmem>>, %arg2: memref<4xi32, #tpu.memory_space<smem>>, %arg3: memref<64x1x128xf32, #tpu.memory_space<vmem>>, %arg4: memref<2x128x512xf32, #tpu.memory_space<vmem>>, %arg5: memref<2x128x512xf32, #tpu.memory_space<vmem>>, %arg6: memref<2x1x512xf32, #tpu.memory_space<vmem>>, %arg7: memref<128x128xf32, #tpu.memory_space<vmem>>, %arg8: memref<1x128xf32, #tpu.memory_space<vmem>>, %arg9: memref<8x128xf32, #tpu.memory_space<vmem>>, %arg10: memref<2x8x128xf32, #tpu.memory_space<vmem>>, %arg11: memref<2x8x128xf32, #tpu.memory_space<vmem>>) attributes {dimension_semantics = [], scalar_prefetch = 0 : i64, scratch_operands = 0 : i64, tpu.core_type = #tpu.core_type<tc>} {
    %c0 = arith.constant 0 : index
    %0 = memref.load %arg2[%c0] : memref<4xi32, #tpu.memory_space<smem>>
    %1 = arith.index_cast %0 : i32 to index
    %c0_0 = arith.constant 0 : index
    %c0_1 = arith.constant 0 : index
    %2 = vector.load %arg3[%1, %c0_0, %c0_1] : memref<64x1x128xf32, #tpu.memory_space<vmem>>, vector<1x1x128xf32>
    %3 = vector.shape_cast %2 : vector<1x1x128xf32> to vector<1x128xf32>
    %c1 = arith.constant 1 : index
    %4 = memref.load %arg2[%c1] : memref<4xi32, #tpu.memory_space<smem>>
    %5 = arith.index_cast %4 : i32 to index
    %c0_2 = arith.constant 0 : index
    %c0_3 = arith.constant 0 : index
    %6 = vector.load %arg3[%5, %c0_2, %c0_3] : memref<64x1x128xf32, #tpu.memory_space<vmem>>, vector<1x1x128xf32>
    %7 = vector.shape_cast %6 : vector<1x1x128xf32> to vector<1x128xf32>
    %c2 = arith.constant 2 : index
    %8 = memref.load %arg2[%c2] : memref<4xi32, #tpu.memory_space<smem>>
    %9 = arith.index_cast %8 : i32 to index
    %c0_4 = arith.constant 0 : index
    %c0_5 = arith.constant 0 : index
    %10 = vector.load %arg3[%9, %c0_4, %c0_5] : memref<64x1x128xf32, #tpu.memory_space<vmem>>, vector<1x1x128xf32>
    %11 = vector.shape_cast %10 : vector<1x1x128xf32> to vector<1x128xf32>
    %c3 = arith.constant 3 : index
    %12 = memref.load %arg2[%c3] : memref<4xi32, #tpu.memory_space<smem>>
    %13 = arith.index_cast %12 : i32 to index
    %c0_6 = arith.constant 0 : index
    %c0_7 = arith.constant 0 : index
    %14 = vector.load %arg3[%13, %c0_6, %c0_7] : memref<64x1x128xf32, #tpu.memory_space<vmem>>, vector<1x1x128xf32>
    %15 = vector.shape_cast %14 : vector<1x1x128xf32> to vector<1x128xf32>
    %cst = arith.constant 0.000000e+00 : f32
    %16 = vector.broadcast %cst : f32 to vector<4x128xf32>
    %17 = tpu.concatenate %3, %7, %11, %15, %16 in 0 : vector<1x128xf32>, vector<1x128xf32>, vector<1x128xf32>, vector<1x128xf32>, vector<4x128xf32> -> vector<8x128xf32>
    %c0_8 = arith.constant 0 : index
    %c0_9 = arith.constant 0 : index
    %c0_10 = arith.constant 0 : index
    %18 = vector.load %arg0[%c0_8, %c0_9, %c0_10] : memref<2x8x128xf32, #tpu.memory_space<vmem>>, vector<1x8x128xf32>
    %19 = vector.shape_cast %18 : vector<1x8x128xf32> to vector<8x128xf32>
    %c0_11 = arith.constant 0 : index
    %c0_12 = arith.constant 0 : index
    %c0_13 = arith.constant 0 : index
    %20 = vector.load %arg1[%c0_11, %c0_12, %c0_13] : memref<2x8x128xf32, #tpu.memory_space<vmem>>, vector<1x8x128xf32>
    %21 = vector.shape_cast %20 : vector<1x8x128xf32> to vector<8x128xf32>
    %c0_14 = arith.constant 0 : index
    %c0_15 = arith.constant 0 : index
    %c0_16 = arith.constant 0 : index
    %22 = vector.load %arg4[%c0_14, %c0_15, %c0_16] : memref<2x128x512xf32, #tpu.memory_space<vmem>>, vector<1x128x512xf32>
    %23 = vector.shape_cast %22 : vector<1x128x512xf32> to vector<128x512xf32>
    %cst_17 = arith.constant dense<0.000000e+00> : vector<8x512xf32>
    %24 = tpu.matmul %17, %23, %cst_17 {dimension_numbers = #tpu.dot_dimension_numbers<[1], [0], [0], [1], [0, 0, 1, 1], [], []>} : vector<8x128xf32>, vector<128x512xf32>, vector<8x512xf32> -> vector<8x512xf32>
    %c0_18 = arith.constant 0 : index
    %c0_19 = arith.constant 0 : index
    %c0_20 = arith.constant 0 : index
    %25 = vector.load %arg5[%c0_18, %c0_19, %c0_20] : memref<2x128x512xf32, #tpu.memory_space<vmem>>, vector<1x128x512xf32>
    %26 = vector.shape_cast %25 : vector<1x128x512xf32> to vector<128x512xf32>
    %cst_21 = arith.constant dense<0.000000e+00> : vector<8x512xf32>
    %27 = tpu.matmul %19, %26, %cst_21 {dimension_numbers = #tpu.dot_dimension_numbers<[1], [0], [0], [1], [0, 0, 1, 1], [], []>} : vector<8x128xf32>, vector<128x512xf32>, vector<8x512xf32> -> vector<8x512xf32>
    %28 = arith.addf %24, %27 : vector<8x512xf32>
    %c0_22 = arith.constant 0 : index
    %c0_23 = arith.constant 0 : index
    %c0_24 = arith.constant 0 : index
    %29 = vector.load %arg6[%c0_22, %c0_23, %c0_24] : memref<2x1x512xf32, #tpu.memory_space<vmem>>, vector<1x1x512xf32>
    %30 = vector.shape_cast %29 : vector<1x1x512xf32> to vector<1x512xf32>
    %31 = vector.broadcast %30 : vector<1x512xf32> to vector<8x512xf32>
    %32 = arith.addf %28, %31 : vector<8x512xf32>
    %33 = math.tanh %32 : vector<8x512xf32>
    %34 = vector.extract_strided_slice %33 {offsets = [0, 0], sizes = [8, 128], strides = [1, 1]} : vector<8x512xf32> to vector<8x128xf32>
    %cst_25 = arith.constant 1.000000e+00 : f32
    %35 = vector.broadcast %cst_25 : f32 to vector<8x128xf32>
    %36 = arith.addf %34, %35 : vector<8x128xf32>
    %cst_26 = arith.constant 5.000000e-01 : f32
    %37 = vector.broadcast %cst_26 : f32 to vector<8x128xf32>
    %38 = arith.mulf %37, %36 : vector<8x128xf32>
    %39 = vector.extract_strided_slice %33 {offsets = [0, 128], sizes = [8, 128], strides = [1, 1]} : vector<8x512xf32> to vector<8x128xf32>
    %cst_27 = arith.constant 1.000000e+00 : f32
    %40 = vector.broadcast %cst_27 : f32 to vector<8x128xf32>
    %41 = arith.addf %39, %40 : vector<8x128xf32>
    %cst_28 = arith.constant 5.000000e-01 : f32
    %42 = vector.broadcast %cst_28 : f32 to vector<8x128xf32>
    %43 = arith.mulf %42, %41 : vector<8x128xf32>
    %44 = vector.extract_strided_slice %33 {offsets = [0, 256], sizes = [8, 128], strides = [1, 1]} : vector<8x512xf32> to vector<8x128xf32>
    %45 = vector.extract_strided_slice %33 {offsets = [0, 384], sizes = [8, 128], strides = [1, 1]} : vector<8x512xf32> to vector<8x128xf32>
    %cst_29 = arith.constant 1.000000e+00 : f32
    %46 = vector.broadcast %cst_29 : f32 to vector<8x128xf32>
    %47 = arith.addf %45, %46 : vector<8x128xf32>
    %cst_30 = arith.constant 5.000000e-01 : f32
    %48 = vector.broadcast %cst_30 : f32 to vector<8x128xf32>
    %49 = arith.mulf %48, %47 : vector<8x128xf32>
    %50 = arith.mulf %43, %21 : vector<8x128xf32>
    %51 = arith.mulf %38, %44 : vector<8x128xf32>
    %52 = arith.addf %50, %51 : vector<8x128xf32>
    %53 = math.tanh %52 : vector<8x128xf32>
    %54 = arith.mulf %49, %53 : vector<8x128xf32>
    %c0_31 = arith.constant 0 : index
    %c0_32 = arith.constant 0 : index
    %c0_33 = arith.constant 0 : index
    %55 = vector.load %arg10[%c0_31, %c0_32, %c0_33] : memref<2x8x128xf32, #tpu.memory_space<vmem>>, vector<1x8x128xf32>
    %56 = vector.shape_cast %55 : vector<1x8x128xf32> to vector<8x128xf32>
    %57 = vector.shape_cast %54 : vector<8x128xf32> to vector<1x8x128xf32>
    tpu.vector_store %arg10[%c0_31, %c0_32, %c0_33], %57 {strides = array<i32>} : memref<2x8x128xf32, #tpu.memory_space<vmem>>, vector<1x8x128xf32>,
    %c0_34 = arith.constant 0 : index
    %c0_35 = arith.constant 0 : index
    %c0_36 = arith.constant 0 : index
    %58 = vector.load %arg11[%c0_34, %c0_35, %c0_36] : memref<2x8x128xf32, #tpu.memory_space<vmem>>, vector<1x8x128xf32>
    %59 = vector.shape_cast %58 : vector<1x8x128xf32> to vector<8x128xf32>
    %60 = vector.shape_cast %52 : vector<8x128xf32> to vector<1x8x128xf32>
    tpu.vector_store %arg11[%c0_34, %c0_35, %c0_36], %60 {strides = array<i32>} : memref<2x8x128xf32, #tpu.memory_space<vmem>>, vector<1x8x128xf32>,
    %c1_37 = arith.constant 1 : index
    %c0_38 = arith.constant 0 : index
    %c0_39 = arith.constant 0 : index
    %61 = vector.load %arg0[%c1_37, %c0_38, %c0_39] : memref<2x8x128xf32, #tpu.memory_space<vmem>>, vector<1x8x128xf32>
    %62 = vector.shape_cast %61 : vector<1x8x128xf32> to vector<8x128xf32>
    %c1_40 = arith.constant 1 : index
    %c0_41 = arith.constant 0 : index
    %c0_42 = arith.constant 0 : index
    %63 = vector.load %arg1[%c1_40, %c0_41, %c0_42] : memref<2x8x128xf32, #tpu.memory_space<vmem>>, vector<1x8x128xf32>
    %64 = vector.shape_cast %63 : vector<1x8x128xf32> to vector<8x128xf32>
    %c1_43 = arith.constant 1 : index
    %c0_44 = arith.constant 0 : index
    %c0_45 = arith.constant 0 : index
    %65 = vector.load %arg4[%c1_43, %c0_44, %c0_45] : memref<2x128x512xf32, #tpu.memory_space<vmem>>, vector<1x128x512xf32>
    %66 = vector.shape_cast %65 : vector<1x128x512xf32> to vector<128x512xf32>
    %cst_46 = arith.constant dense<0.000000e+00> : vector<8x512xf32>
    %67 = tpu.matmul %54, %66, %cst_46 {dimension_numbers = #tpu.dot_dimension_numbers<[1], [0], [0], [1], [0, 0, 1, 1], [], []>} : vector<8x128xf32>, vector<128x512xf32>, vector<8x512xf32> -> vector<8x512xf32>
    %c1_47 = arith.constant 1 : index
    %c0_48 = arith.constant 0 : index
    %c0_49 = arith.constant 0 : index
    %68 = vector.load %arg5[%c1_47, %c0_48, %c0_49] : memref<2x128x512xf32, #tpu.memory_space<vmem>>, vector<1x128x512xf32>
    %69 = vector.shape_cast %68 : vector<1x128x512xf32> to vector<128x512xf32>
    %cst_50 = arith.constant dense<0.000000e+00> : vector<8x512xf32>
    %70 = tpu.matmul %62, %69, %cst_50 {dimension_numbers = #tpu.dot_dimension_numbers<[1], [0], [0], [1], [0, 0, 1, 1], [], []>} : vector<8x128xf32>, vector<128x512xf32>, vector<8x512xf32> -> vector<8x512xf32>
    %71 = arith.addf %67, %70 : vector<8x512xf32>
    %c1_51 = arith.constant 1 : index
    %c0_52 = arith.constant 0 : index
    %c0_53 = arith.constant 0 : index
    %72 = vector.load %arg6[%c1_51, %c0_52, %c0_53] : memref<2x1x512xf32, #tpu.memory_space<vmem>>, vector<1x1x512xf32>
    %73 = vector.shape_cast %72 : vector<1x1x512xf32> to vector<1x512xf32>
    %74 = vector.broadcast %73 : vector<1x512xf32> to vector<8x512xf32>
    %75 = arith.addf %71, %74 : vector<8x512xf32>
    %76 = math.tanh %75 : vector<8x512xf32>
    %77 = vector.extract_strided_slice %76 {offsets = [0, 0], sizes = [8, 128], strides = [1, 1]} : vector<8x512xf32> to vector<8x128xf32>
    %cst_54 = arith.constant 1.000000e+00 : f32
    %78 = vector.broadcast %cst_54 : f32 to vector<8x128xf32>
    %79 = arith.addf %77, %78 : vector<8x128xf32>
    %cst_55 = arith.constant 5.000000e-01 : f32
    %80 = vector.broadcast %cst_55 : f32 to vector<8x128xf32>
    %81 = arith.mulf %80, %79 : vector<8x128xf32>
    %82 = vector.extract_strided_slice %76 {offsets = [0, 128], sizes = [8, 128], strides = [1, 1]} : vector<8x512xf32> to vector<8x128xf32>
    %cst_56 = arith.constant 1.000000e+00 : f32
    %83 = vector.broadcast %cst_56 : f32 to vector<8x128xf32>
    %84 = arith.addf %82, %83 : vector<8x128xf32>
    %cst_57 = arith.constant 5.000000e-01 : f32
    %85 = vector.broadcast %cst_57 : f32 to vector<8x128xf32>
    %86 = arith.mulf %85, %84 : vector<8x128xf32>
    %87 = vector.extract_strided_slice %76 {offsets = [0, 256], sizes = [8, 128], strides = [1, 1]} : vector<8x512xf32> to vector<8x128xf32>
    %88 = vector.extract_strided_slice %76 {offsets = [0, 384], sizes = [8, 128], strides = [1, 1]} : vector<8x512xf32> to vector<8x128xf32>
    %cst_58 = arith.constant 1.000000e+00 : f32
    %89 = vector.broadcast %cst_58 : f32 to vector<8x128xf32>
    %90 = arith.addf %88, %89 : vector<8x128xf32>
    %cst_59 = arith.constant 5.000000e-01 : f32
    %91 = vector.broadcast %cst_59 : f32 to vector<8x128xf32>
    %92 = arith.mulf %91, %90 : vector<8x128xf32>
    %93 = arith.mulf %86, %64 : vector<8x128xf32>
    %94 = arith.mulf %81, %87 : vector<8x128xf32>
    %95 = arith.addf %93, %94 : vector<8x128xf32>
    %96 = math.tanh %95 : vector<8x128xf32>
    %97 = arith.mulf %92, %96 : vector<8x128xf32>
    %c1_60 = arith.constant 1 : index
    %c0_61 = arith.constant 0 : index
    %c0_62 = arith.constant 0 : index
    %98 = vector.load %arg10[%c1_60, %c0_61, %c0_62] : memref<2x8x128xf32, #tpu.memory_space<vmem>>, vector<1x8x128xf32>
    %99 = vector.shape_cast %98 : vector<1x8x128xf32> to vector<8x128xf32>
    %100 = vector.shape_cast %97 : vector<8x128xf32> to vector<1x8x128xf32>
    tpu.vector_store %arg10[%c1_60, %c0_61, %c0_62], %100 {strides = array<i32>} : memref<2x8x128xf32, #tpu.memory_space<vmem>>, vector<1x8x128xf32>,
    %c1_63 = arith.constant 1 : index
    %c0_64 = arith.constant 0 : index
    %c0_65 = arith.constant 0 : index
    %101 = vector.load %arg11[%c1_63, %c0_64, %c0_65] : memref<2x8x128xf32, #tpu.memory_space<vmem>>, vector<1x8x128xf32>
    %102 = vector.shape_cast %101 : vector<1x8x128xf32> to vector<8x128xf32>
    %103 = vector.shape_cast %95 : vector<8x128xf32> to vector<1x8x128xf32>
    tpu.vector_store %arg11[%c1_63, %c0_64, %c0_65], %103 {strides = array<i32>} : memref<2x8x128xf32, #tpu.memory_space<vmem>>, vector<1x8x128xf32>,
    %c0_66 = arith.constant 0 : index
    %c0_67 = arith.constant 0 : index
    %104 = vector.load %arg7[%c0_66, %c0_67] : memref<128x128xf32, #tpu.memory_space<vmem>>, vector<128x128xf32>
    %cst_68 = arith.constant dense<0.000000e+00> : vector<8x128xf32>
    %105 = tpu.matmul %97, %104, %cst_68 {dimension_numbers = #tpu.dot_dimension_numbers<[1], [0], [0], [1], [0, 0, 1, 1], [], []>} : vector<8x128xf32>, vector<128x128xf32>, vector<8x128xf32> -> vector<8x128xf32>
    %c0_69 = arith.constant 0 : index
    %c0_70 = arith.constant 0 : index
    %106 = vector.load %arg8[%c0_69, %c0_70] : memref<1x128xf32, #tpu.memory_space<vmem>>, vector<1x128xf32>
    %107 = vector.broadcast %106 : vector<1x128xf32> to vector<8x128xf32>
    %108 = arith.addf %105, %107 : vector<8x128xf32>
    %c0_71 = arith.constant 0 : index
    %c0_72 = arith.constant 0 : index
    %109 = vector.load %arg9[%c0_71, %c0_72] : memref<8x128xf32, #tpu.memory_space<vmem>>, vector<8x128xf32>
    tpu.vector_store %arg9[%c0_71, %c0_72], %108 {strides = array<i32>} : memref<8x128xf32, #tpu.memory_space<vmem>>, vector<8x128xf32>,
    return
  }
}

</mosaic_0001>

<bundles_post_ra>
// kernel: seq_decoder_step.1
= control target key start
LH: loop header
LB: loop body
LE: loop exit
PB: predicated region body
PF: predicated region fallthrough
CT: control target
= control target key end

     0   :  { %17 = vsyncpa [#allocation3], 0  ;;  %s2132_s0 = inlined_call_operand.hbm [shape: f32[2,8,128], index: 0, kind: input, shape index: {}, may-alias: {0,10}]   ;;  %s2133_s1 = inlined_call_operand.hbm [shape: f32[2,8,128], index: 1, kind: input, shape index: {}, may-alias: {1,11}]   ;;  %s2134_s2 = inlined_call_operand.hbm [shape: s32[4], index: 2, kind: input, shape index: {}]   ;;  %s2135_s3 = inlined_call_operand.hbm [shape: f32[64,1,128], index: 3, kind: input, shape index: {}]   ;;  %s2136_s4 = inlined_call_operand.hbm [shape: f32[2,128,512], index: 4, kind: input, shape index: {}]   ;;  %s2137_s5 = inlined_call_operand.hbm [shape: f32[2,128,512], index: 5, kind: input, shape index: {}]   ;;  %s2138_s6 = inlined_call_operand.vmem [shape: f32[2,1,512], index: 6, kind: input, shape index: {}]   ;;  %s2139_s7 = inlined_call_operand.hbm [shape: f32[128,128], index: 7, kind: input, shape index: {}]   ;;  %s2140_s8 = inlined_call_operand.vmem [shape: f32[1,128], index: 8, kind: input, shape index: {}]   ;;  %s2141_s9 = inlined_call_operand.hbm [shape: f32[8,128], index: 9, kind: output, shape index: {0}]   ;;  %s2142_s10 = inlined_call_operand.hbm [shape: f32[2,8,128], index: 10, kind: output, shape index: {1}, may-alias: {0,10}]   ;;  %s2143_s11 = inlined_call_operand.hbm [shape: f32[2,8,128], index: 11, kind: output, shape index: {2}, may-alias: {1,11}]  }
   0x1   :  { %18 = vsyncpa [#allocation7], 0 }
   0x2   :  { %19 = vsyncpa [#allocation5], 0 }
   0x3   :  { %20 = vsyncpa [#allocation11], 0 }
   0x4   :  { %21 = vsyncpa [#allocation14], 0 }
   0x5   :  { %22 = vsyncpa [#allocation4], 0 }
   0x6   :  { %23 = vsyncpa [#allocation17], 0  ;;  %s1850_s17 = smov [#allocation6]   ;;  %s1851_s19 = smov [#allocation10]  }
   0x7   :  { %s41_s18 = sshll.u32 %s1850_s17, 4  ;;  %s73_s20 = sshll.u32 %s1851_s19, 4  ;;  %s42_s18 = int_to_ptr.vmem [resolvable:$true] %s41_s18  ;;  %s1929_s20 = int_to_ptr.vmem [resolvable:$true] %s73_s20 }
   0x8   :  { %s1626_s23 = scalar_lea.hbm %s2133_s1, 256 }
   0x9   :  { %p1627_p0 = scmp.ne.s32.totalorder %s2133_s1, %s1626_s23  ;;  %p1630_p1 = scmp.lt.u32.totalorder %s1626_s23, %s2133_s1 }
   0xb   :  { %p1632_p2 = pnand %p1630_p1, %p1627_p0 }
   0xd   :  { %1635 = shalt.err (!%p1632_p2)
}
   0xe   :  { %s1636_s28 = scalar_lea.vmem %s42_s18, 256  ;;  %p1641_p4 = scmp.lt.s32.totalorder %s42_s18, %s42_s18 }
   0xf   :  { %p1637_p3 = scmp.ne.s32.totalorder %s42_s18, %s1636_s28  ;;  %p1642_p5 = scmp.lt.s32.totalorder %s1636_s28, %s1636_s28 }
  0x11   :  { %p1643_p6 = por %p1642_p5, %p1641_p4 }
  0x13   :  { %p1644_p7 = pnand %p1643_p6, %p1637_p3 }
  0x15   :  { %1647 = shalt.err (!%p1644_p7)
}
  0x16   :  { %s1852_s29 = smov 128   ;;  %s1853_s30 = smov 8  }
  0x17   :  { %47 = dma.hbm_to_vmem [thread:$0]  %s2133_s1, 256, %s42_s18, [#allocation7], %s1852_s29, %s1852_s29, %s1853_s30  }
  0x18   :  { %s1648_s16 = scalar_lea.hbm %s2136_s4, 16384 }
  0x19   :  { %p1649_p8 = scmp.ne.s32.totalorder %s2136_s4, %s1648_s16  ;;  %p1652_p9 = scmp.lt.u32.totalorder %s1648_s16, %s2136_s4 }
  0x1b   :  { %p1654_p10 = pnand %p1652_p9, %p1649_p8 }
  0x1d   :  { %1657 = shalt.err (!%p1654_p10)
}
  0x1e   :  { %s1658_s23 = scalar_lea.vmem %s1929_s20, 16384  ;;  %p1663_p12 = scmp.lt.s32.totalorder %s1929_s20, %s1929_s20 }
  0x1f   :  { %p1659_p11 = scmp.ne.s32.totalorder %s1929_s20, %s1658_s23  ;;  %p1664_p13 = scmp.lt.s32.totalorder %s1658_s23, %s1658_s23 }
  0x21   :  { %p1665_p0 = por %p1664_p13, %p1663_p12 }
  0x23   :  { %p1666_p1 = pnand %p1665_p0, %p1659_p11 }
  0x25   :  { %1669 = shalt.err (!%p1666_p1)
}
  0x26   :  { %s1854_s1 = smov 512   ;;  %s1855_s18 = smov 32  }
  0x27   :  { %79 = dma.hbm_to_vmem [thread:$0]  %s2136_s4, 16384, %s1929_s20, [#allocation11], %s1854_s1, %s1854_s1, %s1855_s18  }
  0x28   :  { %s1856_s26 = smov [#allocation2]   ;;  %s1857_s28 = smov [#allocation9]  }
  0x29   :  { %s29_s27 = sshll.u32 %s1856_s26, 4  ;;  %s61_s12 = sshll.u32 %s1857_s28, 4  ;;  %s30_s27 = int_to_ptr.vmem [resolvable:$true] %s29_s27  ;;  %s62_s12 = int_to_ptr.vmem [resolvable:$true] %s61_s12 }
  0x2a   :  { %s1670_s15 = scalar_lea.hbm %s2132_s0, 256 }
  0x2b   :  { %p1671_p2 = scmp.ne.s32.totalorder %s2132_s0, %s1670_s15  ;;  %p1674_p3 = scmp.lt.u32.totalorder %s1670_s15, %s2132_s0 }
  0x2d   :  { %p1676_p4 = pnand %p1674_p3, %p1671_p2 }
  0x2f   :  { %1679 = shalt.err (!%p1676_p4)
}
  0x30   :  { %s1680_s4 = scalar_lea.vmem %s30_s27, 256  ;;  %p1685_p6 = scmp.lt.s32.totalorder %s30_s27, %s30_s27 }
  0x31   :  { %p1681_p5 = scmp.ne.s32.totalorder %s30_s27, %s1680_s4  ;;  %p1686_p7 = scmp.lt.s32.totalorder %s1680_s4, %s1680_s4 }
  0x33   :  { %p1687_p8 = por %p1686_p7, %p1685_p6 }
  0x35   :  { %p1688_p9 = pnand %p1687_p8, %p1681_p5 }
  0x37   :  { %1691 = shalt.err (!%p1688_p9)
}
  0x38   :  { %35 = dma.hbm_to_vmem [thread:$0]  %s2132_s0, 256, %s30_s27, [#allocation3], %s1852_s29, %s1852_s29, %s1853_s30  }
  0x39   :  { %s1692_s25 = scalar_lea.hbm %s2134_s2, 16 }
  0x3a   :  { %p1693_p10 = scmp.ne.s32.totalorder %s2134_s2, %s1692_s25  ;;  %p1696_p11 = scmp.lt.u32.totalorder %s1692_s25, %s2134_s2 }
  0x3c   :  { %p1698_p12 = pnand %p1696_p11, %p1693_p10 }
  0x3e   :  { %1701 = shalt.err (!%p1698_p12)
}
  0x3f   :  { %s1858_s15 = smov [#allocation8]   ;;  %s1702_s19 = scalar_lea.hbm %s2135_s3, 1024 }
  0x40   :  { %55 = dma.hbm_to_smem %s2134_s2, 16, %s1858_s15, [#allocation5]  }
  0x41   :  { %p1703_p13 = scmp.ne.s32.totalorder %s2135_s3, %s1702_s19  ;;  %p1706_p0 = scmp.lt.u32.totalorder %s1702_s19, %s2135_s3 }
  0x43   :  { %p1708_p1 = pnand %p1706_p0, %p1703_p13 }
  0x45   :  { %1711 = shalt.err (!%p1708_p1)
}
  0x46   :  { %s1712_s23 = scalar_lea.vmem %s62_s12, 1024  ;;  %p1717_p3 = scmp.lt.s32.totalorder %s62_s12, %s62_s12 }
  0x47   :  { %p1713_p2 = scmp.ne.s32.totalorder %s62_s12, %s1712_s23  ;;  %p1718_p4 = scmp.lt.s32.totalorder %s1712_s23, %s1712_s23 }
  0x49   :  { %p1719_p5 = por %p1718_p4, %p1717_p3 }
  0x4b   :  { %p1720_p6 = pnand %p1719_p5, %p1713_p2 }
  0x4d   :  { %1723 = shalt.err (!%p1720_p6)
}
  0x4e   :  { %s1859_s2 = smov 16   ;;  %s1860_s24 = smov 1  }
  0x4f   :  { %67 = dma.hbm_to_vmem [thread:$0]  %s2135_s3, 1024, %s62_s12, [#allocation7], %s1859_s2, %s1859_s2, %s1860_s24  }
  0x50   :  { %s1861_s28 = smov [#allocation12]   ;;  %s1862_s14 = smov [#allocation13]  }
  0x51   :  { %s85_s13 = sshll.u32 %s1861_s28, 4  ;;  %s99_s15 = sshll.u32 %s1862_s14, 4  ;;  %s86_s13 = int_to_ptr.vmem [resolvable:$true] %s85_s13  ;;  %s100_s15 = int_to_ptr.vmem [resolvable:$true] %s99_s15 }
  0x52   :  { %s1724_s0 = scalar_lea.hbm %s2137_s5, 16384 }
  0x53   :  { %p1725_p7 = scmp.ne.s32.totalorder %s2137_s5, %s1724_s0  ;;  %p1728_p8 = scmp.lt.u32.totalorder %s1724_s0, %s2137_s5 }
  0x55   :  { %p1730_p9 = pnand %p1728_p8, %p1725_p7 }
  0x57   :  { %1733 = shalt.err (!%p1730_p9)
}
  0x58   :  { %s1734_s3 = scalar_lea.vmem %s86_s13, 16384  ;;  %p1739_p11 = scmp.lt.s32.totalorder %s86_s13, %s86_s13 }
  0x59   :  { %p1735_p10 = scmp.ne.s32.totalorder %s86_s13, %s1734_s3  ;;  %p1740_p12 = scmp.lt.s32.totalorder %s1734_s3, %s1734_s3 }
  0x5b   :  { %p1741_p13 = por %p1740_p12, %p1739_p11 }
  0x5d   :  { %p1742_p0 = pnand %p1741_p13, %p1735_p10 }
  0x5f   :  { %1745 = shalt.err (!%p1742_p0)
}
  0x60   :  { %91 = dma.hbm_to_vmem [thread:$0]  %s2137_s5, 16384, %s86_s13, [#allocation11], %s1854_s1, %s1854_s1, %s1855_s18  }
  0x61   :  { %s1746_s2 = scalar_lea.hbm %s2139_s7, 2048 }
  0x62   :  { %p1747_p1 = scmp.ne.s32.totalorder %s2139_s7, %s1746_s2  ;;  %p1750_p2 = scmp.lt.u32.totalorder %s1746_s2, %s2139_s7 }
  0x64   :  { %p1752_p3 = pnand %p1750_p2, %p1747_p1 }
  0x66   :  { %1755 = shalt.err (!%p1752_p3)
}
  0x67   :  { %s1756_s14 = scalar_lea.vmem %s100_s15, 2048  ;;  %p1761_p5 = scmp.lt.s32.totalorder %s100_s15, %s100_s15 }
  0x68   :  { %p1757_p4 = scmp.ne.s32.totalorder %s100_s15, %s1756_s14  ;;  %p1762_p6 = scmp.lt.s32.totalorder %s1756_s14, %s1756_s14 }
  0x6a   :  { %p1763_p7 = por %p1762_p6, %p1761_p5 }
  0x6c   :  { %p1764_p8 = pnand %p1763_p7, %p1757_p4 }
  0x6e   :  { %1767 = shalt.err (!%p1764_p8)
}
  0x6f   :  { %105 = dma.hbm_to_vmem [thread:$0]  %s2139_s7, 2048, %s100_s15, [#allocation14], %s1852_s29, %s1852_s29, %s1853_s30  }
  0x70   :  { %1834 = dma.done.wait [#allocation3], 256  }
  0x71   :  { %1835 = vsyncadd [#allocation3], 4294967040 }
  0x72   :  { %1836 = dma.done.wait [#allocation7], 256  }
  0x73   :  { %1837 = vsyncadd [#allocation7], 4294967040 }
  0x74   :  { %1838 = dma.done.wait [#allocation5], 16  }
  0x75   :  { %1839 = vsyncadd [#allocation5], 4294967280 }
  0x76   :  { %1840 = dma.done.wait [#allocation7], 1024  }
  0x77   :  { %1841 = vsyncadd [#allocation7], 4294966272 }
  0x78   :  { %1842 = dma.done.wait [#allocation11], 32768  }
  0x79   :  { %1843 = vsyncadd [#allocation11], 4294934528 }
  0x7a   :  { %1844 = dma.done.wait [#allocation14], 2048  }
  0x7b   :  { %1845 = vsyncadd [#allocation14], 4294965248 }
  0x7c   :  { %129 = sfence }
  0x7d   :  { %v235_v0 = vld [vmem:[#allocation12 + $0x8] sm:$0xff]  ;;  %v237_v2 = vld [vmem:[#allocation12 + $0x18] sm:$0xff]  ;;  %v234_v5 = vld [vmem:[#allocation12] sm:$0xff]  ;;  %v1863_v7 = vmov 0.0   ;;  %s2039_s7 = sld [smem:[#allocation8]]  ;;  %s2041_s18 = sld [smem:[#allocation8 + $0x1]] }
  0x7e   :  { %v239_v1 = vld [vmem:[#allocation12 + $0x28] sm:$0xff]  ;;  %v241_v4 = vld [vmem:[#allocation12 + $0x38] sm:$0xff]  ;;  %v238_v6 = vld [vmem:[#allocation12 + $0x20] sm:$0xff]  ;;  %362 = vmatprep.mubr.f32.mxu0 %v1863_v7  ;;  %433 = vmatprep.mubr.f32.mxu1 %v1863_v7  ;;  %s2043_s13 = sld [smem:[#allocation8 + $0x2]]  ;;  %s2045_s15 = sld [smem:[#allocation8 + $0x3]]  ;;  %vm160_vm0 = vcmask 1040384  }
  0x7f   :  { %v1299_v3 = vpack.c.bf16 %v239_v1, %v235_v0  ;;  %v1331_v8 = vpack.c.bf16 %v241_v4, %v237_v2  ;;  %v1301_v9 = vpack.c.bf16 %v238_v6, %v234_v5  ;;  %v236_v10 = vld [vmem:[#allocation12 + $0x10] sm:$0xff]  ;;  %v243_v12 = vld [vmem:[#allocation12 + $0x48] sm:$0xff]  ;;  %v245_v15 = vld [vmem:[#allocation12 + $0x58] sm:$0xff]  ;;  %vm162_vm1 = vcmask 1041408  }
  0x80   :  { %v240_v11 = vld [vmem:[#allocation12 + $0x30] sm:$0xff]  ;;  %v247_v14 = vld [vmem:[#allocation12 + $0x68] sm:$0xff]  ;;  %v249_v16 = vld [vmem:[#allocation12 + $0x78] sm:$0xff]  ;;  %vm164_vm2 = vcmask 1042432   ;;  %vm166_vm3 = vcmask 1043456   ;;  %vm1865_vm4 = vmmov 0  }
  0x81   :  { %1300 = vmatprep.subr.bf16.mxu0 %v1299_v3  ;;  %v1333_v13 = vpack.c.bf16 %v240_v11, %v236_v10  ;;  %1332 = vmatprep.subr.bf16.mxu1 %v1331_v8  ;;  %v1303_v17 = vpack.c.bf16 %v247_v14, %v243_v12  ;;  %v1335_v18 = vpack.c.bf16 %v249_v16, %v245_v15  ;;  %v242_v19 = vld [vmem:[#allocation12 + $0x40] sm:$0xff]  ;;  %v244_v21 = vld [vmem:[#allocation12 + $0x50] sm:$0xff]  ;;  %v251_v24 = vld [vmem:[#allocation12 + $0x88] sm:$0xff] }
  0x82   :  { %1302 = vmatpush1.bf16.msra.mxu0 %v1301_v9  ;;  %v246_v20 = vld [vmem:[#allocation12 + $0x60] sm:$0xff]  ;;  %v248_v23 = vld [vmem:[#allocation12 + $0x70] sm:$0xff]  ;;  %v255_v25 = vld [vmem:[#allocation12 + $0xa8] sm:$0xff] }
  0x83   :  { %1334 = vmatpush1.bf16.msra.mxu1 %v1333_v13  ;;  %v1305_v22 = vpack.c.bf16 %v246_v20, %v242_v19  ;;  %1304 = vmatprep.subr.bf16.mxu0 %v1303_v17  ;;  %v1337_v26 = vpack.c.bf16 %v248_v23, %v244_v21  ;;  %v1307_v27 = vpack.c.bf16 %v255_v25, %v251_v24  ;;  %v253_v28 = vld [vmem:[#allocation12 + $0x98] sm:$0xff]  ;;  %v250_v30 = vld [vmem:[#allocation12 + $0x80] sm:$0xff]  ;;  %v252_v33 = vld [vmem:[#allocation12 + $0x90] sm:$0xff]  ;;  %s131_s16 = scalar_lea.vmem [#allocation9], %s2039_s7  ;;  %s134_s17 = scalar_lea.vmem [#allocation9], %s2041_s18 }
  0x84   :  { %1336 = vmatprep.subr.bf16.mxu1 %v1335_v18  ;;  %v257_v29 = vld [vmem:[#allocation12 + $0xb8] sm:$0xff]  ;;  %v254_v32 = vld [vmem:[#allocation12 + $0xa0] sm:$0xff]  ;;  %v256_v34 = vld [vmem:[#allocation12 + $0xb0] sm:$0xff]  ;;  %s137_s0 = scalar_lea.vmem [#allocation9], %s2043_s13  ;;  %s140_s27 = scalar_lea.vmem [#allocation9], %s2045_s15 }
  0x85   :  { %v1339_v31 = vpack.c.bf16 %v257_v29, %v253_v28  ;;  %v1309_v35 = vpack.c.bf16 %v254_v32, %v250_v30  ;;  %v259_v36 = vld [vmem:[#allocation12 + $0xc8] sm:$0xff]  ;;  %v261_v38 = vld [vmem:[#allocation12 + $0xd8] sm:$0xff]  ;;  %v1341_v39 = vpack.c.bf16 %v256_v34, %v252_v33  ;;  %v258_v42 = vld [vmem:[#allocation12 + $0xc0] sm:$0xff] }
  0x86   :  { %1306 = vmatpush1.bf16.msra.mxu0 %v1305_v22  ;;  %v263_v37 = vld [vmem:[#allocation12 + $0xe8] sm:$0xff]  ;;  %v265_v41 = vld [vmem:[#allocation12 + $0xf8] sm:$0xff]  ;;  %v262_v43 = vld [vmem:[#allocation12 + $0xe0] sm:$0xff] }
  0x87   :  { %1338 = vmatpush1.bf16.msra.mxu1 %v1337_v26  ;;  %1308 = vmatprep.subr.bf16.mxu0 %v1307_v27  ;;  %v1311_v40 = vpack.c.bf16 %v263_v37, %v259_v36  ;;  %v1343_v44 = vpack.c.bf16 %v265_v41, %v261_v38  ;;  %v260_v45 = vld [vmem:[#allocation12 + $0xd0] sm:$0xff]  ;;  %v267_v47 = vld [vmem:[#allocation12 + $0x108] sm:$0xff]  ;;  %v269_v49 = vld [vmem:[#allocation12 + $0x118] sm:$0xff]  ;;  %v1313_v51 = vpack.c.bf16 %v262_v43, %v258_v42 }
  0x88   :  { %1340 = vmatprep.subr.bf16.mxu1 %v1339_v31  ;;  %v264_v46 = vld [vmem:[#allocation12 + $0xf0] sm:$0xff]  ;;  %v271_v48 = vld [vmem:[#allocation12 + $0x128] sm:$0xff]  ;;  %v273_v50 = vld [vmem:[#allocation12 + $0x138] sm:$0xff] }
  0x89   :  { %v1345_v52 = vpack.c.bf16 %v264_v46, %v260_v45  ;;  %v1315_v53 = vpack.c.bf16 %v271_v48, %v267_v47  ;;  %v266_v54 = vld [vmem:[#allocation12 + $0x100] sm:$0xff]  ;;  %v268_v56 = vld [vmem:[#allocation12 + $0x110] sm:$0xff]  ;;  %v1347_v57 = vpack.c.bf16 %v273_v50, %v269_v49  ;;  %v275_v59 = vld [vmem:[#allocation12 + $0x148] sm:$0xff] }
  0x8a   :  { %1310 = vmatpush1.bf16.msra.mxu0 %v1309_v35  ;;  %v270_v55 = vld [vmem:[#allocation12 + $0x120] sm:$0xff]  ;;  %v272_v58 = vld [vmem:[#allocation12 + $0x130] sm:$0xff]  ;;  %v279_v60 = vld [vmem:[#allocation12 + $0x168] sm:$0xff] }
  0x8b   :  { %1342 = vmatpush1.bf16.msra.mxu1 %v1341_v39  ;;  %1312 = vmatprep.subr.bf16.mxu0 %v1311_v40  ;;  %v277_v61 = vld [vmem:[#allocation12 + $0x158] sm:$0xff]  ;;  %v1317_v63 = vpack.c.bf16 %v270_v55, %v266_v54  ;;  %v1349_v0 = vpack.c.bf16 %v272_v58, %v268_v56  ;;  %v1319_v1 = vpack.c.bf16 %v279_v60, %v275_v59  ;;  %v274_v2 = vld [vmem:[#allocation12 + $0x140] sm:$0xff]  ;;  %v276_v4 = vld [vmem:[#allocation12 + $0x150] sm:$0xff] }
  0x8c   :  { %1344 = vmatprep.subr.bf16.mxu1 %v1343_v44  ;;  %v281_v62 = vld [vmem:[#allocation12 + $0x178] sm:$0xff]  ;;  %v278_v3 = vld [vmem:[#allocation12 + $0x160] sm:$0xff]  ;;  %v280_v6 = vld [vmem:[#allocation12 + $0x170] sm:$0xff] }
  0x8d   :  { %v1351_v5 = vpack.c.bf16 %v281_v62, %v277_v61  ;;  %v283_v8 = vld [vmem:[#allocation12 + $0x188] sm:$0xff]  ;;  %v285_v10 = vld [vmem:[#allocation12 + $0x198] sm:$0xff]  ;;  %v1321_v12 = vpack.c.bf16 %v278_v3, %v274_v2  ;;  %v1353_v13 = vpack.c.bf16 %v280_v6, %v276_v4  ;;  %v282_v15 = vld [vmem:[#allocation12 + $0x180] sm:$0xff] }
  0x8e   :  { %1314 = vmatpush1.bf16.msra.mxu0 %v1313_v51  ;;  %v287_v9 = vld [vmem:[#allocation12 + $0x1a8] sm:$0xff]  ;;  %v289_v11 = vld [vmem:[#allocation12 + $0x1b8] sm:$0xff]  ;;  %v286_v16 = vld [vmem:[#allocation12 + $0x1a0] sm:$0xff] }
  0x8f   :  { %1346 = vmatpush1.bf16.msra.mxu1 %v1345_v52  ;;  %1316 = vmatprep.subr.bf16.mxu0 %v1315_v53  ;;  %v1323_v14 = vpack.c.bf16 %v287_v9, %v283_v8  ;;  %v284_v17 = vld [vmem:[#allocation12 + $0x190] sm:$0xff]  ;;  %v1355_v18 = vpack.c.bf16 %v289_v11, %v285_v10  ;;  %v291_v20 = vld [vmem:[#allocation12 + $0x1c8] sm:$0xff]  ;;  %v293_v22 = vld [vmem:[#allocation12 + $0x1d8] sm:$0xff]  ;;  %v1325_v24 = vpack.c.bf16 %v286_v16, %v282_v15 }
  0x90   :  { %1348 = vmatprep.subr.bf16.mxu1 %v1347_v57  ;;  %v288_v19 = vld [vmem:[#allocation12 + $0x1b0] sm:$0xff]  ;;  %v295_v21 = vld [vmem:[#allocation12 + $0x1e8] sm:$0xff]  ;;  %v297_v23 = vld [vmem:[#allocation12 + $0x1f8] sm:$0xff] }
  0x91   :  { %v1357_v25 = vpack.c.bf16 %v288_v19, %v284_v17  ;;  %v1327_v26 = vpack.c.bf16 %v295_v21, %v291_v20  ;;  %v290_v27 = vld [vmem:[#allocation12 + $0x1c0] sm:$0xff]  ;;  %v292_v29 = vld [vmem:[#allocation12 + $0x1d0] sm:$0xff]  ;;  %v1359_v30 = vpack.c.bf16 %v297_v23, %v293_v22  ;;  %v171_v32 = vld [vmem:[#allocation10 + $0x8] sm:$0xff] }
  0x92   :  { %1318 = vmatpush1.bf16.msra.mxu0 %v1317_v63  ;;  %v294_v28 = vld [vmem:[#allocation12 + $0x1e0] sm:$0xff]  ;;  %v296_v31 = vld [vmem:[#allocation12 + $0x1f0] sm:$0xff]  ;;  %v175_v33 = vld [vmem:[#allocation10 + $0x28] sm:$0xff] }
  0x93   :  { %1350 = vmatpush1.bf16.msra.mxu1 %v1349_v0  ;;  %1320 = vmatprep.subr.bf16.mxu0 %v1319_v1  ;;  %v173_v34 = vld [vmem:[#allocation10 + $0x18] sm:$0xff]  ;;  %v1329_v36 = vpack.c.bf16 %v294_v28, %v290_v27  ;;  %v1361_v37 = vpack.c.bf16 %v296_v31, %v292_v29  ;;  %v1363_v38 = vpack.c.bf16 %v175_v33, %v171_v32  ;;  %v170_v39 = vld [vmem:[#allocation10] sm:$0xff]  ;;  %v172_v41 = vld [vmem:[#allocation10 + $0x10] sm:$0xff] }
  0x94   :  { %1352 = vmatprep.subr.bf16.mxu1 %v1351_v5  ;;  %v177_v35 = vld [vmem:[#allocation10 + $0x38] sm:$0xff]  ;;  %v174_v40 = vld [vmem:[#allocation10 + $0x20] sm:$0xff]  ;;  %v176_v43 = vld [vmem:[#allocation10 + $0x30] sm:$0xff] }
  0x95   :  { %v1395_v42 = vpack.c.bf16 %v177_v35, %v173_v34  ;;  %v179_v44 = vld [vmem:[#allocation10 + $0x48] sm:$0xff]  ;;  %v181_v46 = vld [vmem:[#allocation10 + $0x58] sm:$0xff]  ;;  %v168_v48 = vld [vmem:[#allocation2] sm:$0xff]  ;;  %v1365_v49 = vpack.c.bf16 %v174_v40, %v170_v39  ;;  %v1397_v50 = vpack.c.bf16 %v176_v43, %v172_v41 }
  0x96   :  { %1322 = vmatpush1.bf16.msra.mxu0 %v1321_v12  ;;  %v183_v45 = vld [vmem:[#allocation10 + $0x68] sm:$0xff]  ;;  %v185_v47 = vld [vmem:[#allocation10 + $0x78] sm:$0xff]  ;;  %v178_v52 = vld [vmem:[#allocation10 + $0x40] sm:$0xff] }
  0x97   :  { %1354 = vmatpush1.bf16.msra.mxu1 %v1353_v13  ;;  %1324 = vmatprep.subr.bf16.mxu0 %v1323_v14  ;;  %v1367_v51 = vpack.c.bf16 %v183_v45, %v179_v44  ;;  %v182_v53 = vld [vmem:[#allocation10 + $0x60] sm:$0xff]  ;;  %v180_v54 = vld [vmem:[#allocation10 + $0x50] sm:$0xff]  ;;  %v1399_v55 = vpack.c.bf16 %v185_v47, %v181_v46  ;;  %v187_v57 = vld [vmem:[#allocation10 + $0x88] sm:$0xff] }
  0x98   :  { %1356 = vmatprep.subr.bf16.mxu1 %v1355_v18  ;;  %v184_v56 = vld [vmem:[#allocation10 + $0x70] sm:$0xff]  ;;  %v191_v58 = vld [vmem:[#allocation10 + $0xa8] sm:$0xff]  ;;  %v189_v59 = vld [vmem:[#allocation10 + $0x98] sm:$0xff]  ;;  %v1369_v61 = vpack.c.bf16 %v182_v53, %v178_v52 }
  0x99   :  { %v193_v60 = vld [vmem:[#allocation10 + $0xb8] sm:$0xff]  ;;  %v1401_v62 = vpack.c.bf16 %v184_v56, %v180_v54  ;;  %v1371_v63 = vpack.c.bf16 %v191_v58, %v187_v57  ;;  %v186_v0 = vld [vmem:[#allocation10 + $0x80] sm:$0xff]  ;;  %v188_v2 = vld [vmem:[#allocation10 + $0x90] sm:$0xff] }
  0x9a   :  { %1326 = vmatpush1.bf16.msra.mxu0 %v1325_v24  ;;  %v190_v1 = vld [vmem:[#allocation10 + $0xa0] sm:$0xff]  ;;  %v1403_v3 = vpack.c.bf16 %v193_v60, %v189_v59  ;;  %v192_v4 = vld [vmem:[#allocation10 + $0xb0] sm:$0xff]  ;;  %v195_v5 = vld [vmem:[#allocation10 + $0xc8] sm:$0xff] }
  0x9b   :  { %1358 = vmatpush1.bf16.msra.mxu1 %v1357_v25  ;;  %1328 = vmatprep.subr.bf16.mxu0 %v1327_v26  ;;  %v199_v6 = vld [vmem:[#allocation10 + $0xe8] sm:$0xff]  ;;  %v197_v8 = vld [vmem:[#allocation10 + $0xd8] sm:$0xff]  ;;  %v1373_v10 = vpack.c.bf16 %v190_v1, %v186_v0  ;;  %v1405_v11 = vpack.c.bf16 %v192_v4, %v188_v2  ;;  %v194_v13 = vld [vmem:[#allocation10 + $0xc0] sm:$0xff] }
  0x9c   :  { %1360 = vmatprep.subr.bf16.mxu1 %v1359_v30  ;;  %v201_v9 = vld [vmem:[#allocation10 + $0xf8] sm:$0xff]  ;;  %v1375_v12 = vpack.c.bf16 %v199_v6, %v195_v5  ;;  %v198_v14 = vld [vmem:[#allocation10 + $0xe0] sm:$0xff]  ;;  %v196_v15 = vld [vmem:[#allocation10 + $0xd0] sm:$0xff] }
  0x9d   :  { %v1407_v16 = vpack.c.bf16 %v201_v9, %v197_v8  ;;  %v200_v17 = vld [vmem:[#allocation10 + $0xf0] sm:$0xff]  ;;  %v203_v18 = vld [vmem:[#allocation10 + $0x108] sm:$0xff]  ;;  %v205_v20 = vld [vmem:[#allocation10 + $0x118] sm:$0xff]  ;;  %v1377_v22 = vpack.c.bf16 %v198_v14, %v194_v13 }
  0x9e   :  { %1330 = vmatpush1.bf16.msra.mxu0 %v1329_v36  ;;  %v207_v19 = vld [vmem:[#allocation10 + $0x128] sm:$0xff]  ;;  %v209_v21 = vld [vmem:[#allocation10 + $0x138] sm:$0xff]  ;;  %v1409_v23 = vpack.c.bf16 %v200_v17, %v196_v15  ;;  %v202_v25 = vld [vmem:[#allocation10 + $0x100] sm:$0xff] }
  0x9f   :  { %1362 = vmatpush1.bf16.msra.mxu1 %v1361_v37  ;;  %1364 = vmatprep.subr.bf16.mxu0 %v1363_v38  ;;  %v1379_v24 = vpack.c.bf16 %v207_v19, %v203_v18  ;;  %v206_v26 = vld [vmem:[#allocation10 + $0x120] sm:$0xff]  ;;  %v204_v27 = vld [vmem:[#allocation10 + $0x110] sm:$0xff]  ;;  %v1411_v28 = vpack.c.bf16 %v209_v21, %v205_v20  ;;  %v211_v30 = vld [vmem:[#allocation10 + $0x148] sm:$0xff] }
  0xa0   :  { %1396 = vmatprep.subr.bf16.mxu1 %v1395_v42  ;;  %v208_v29 = vld [vmem:[#allocation10 + $0x130] sm:$0xff]  ;;  %v215_v31 = vld [vmem:[#allocation10 + $0x168] sm:$0xff]  ;;  %v213_v32 = vld [vmem:[#allocation10 + $0x158] sm:$0xff]  ;;  %v1381_v34 = vpack.c.bf16 %v206_v26, %v202_v25 }
  0xa1   :  { %363 = vmatmul.mubr.f32.vlgmr.msra.gmra.mrb[0].mxu0 %v168_v48  ;;  %v217_v33 = vld [vmem:[#allocation10 + $0x178] sm:$0xff]  ;;  %v1413_v35 = vpack.c.bf16 %v208_v29, %v204_v27  ;;  %v1383_v36 = vpack.c.bf16 %v215_v31, %v211_v30  ;;  %v210_v37 = vld [vmem:[#allocation10 + $0x140] sm:$0xff]  ;;  %v212_v39 = vld [vmem:[#allocation10 + $0x150] sm:$0xff] }
  0xa2   :  { %434 = vmatmul.mubr.f32.vlgmr.msra.gmra.mrb[0].mxu1 %v168_v48  ;;  %1366 = vmatpush1.bf16.msra.mxu0 %v1365_v49  ;;  %v214_v38 = vld [vmem:[#allocation10 + $0x160] sm:$0xff]  ;;  %v1415_v40 = vpack.c.bf16 %v217_v33, %v213_v32  ;;  %v216_v41 = vld [vmem:[#allocation10 + $0x170] sm:$0xff]  ;;  %v219_v42 = vld [vmem:[#allocation10 + $0x188] sm:$0xff] }
  0xa3   :  { %1398 = vmatpush1.bf16.msra.mxu1 %v1397_v50  ;;  %1368 = vmatprep.subr.bf16.mxu0 %v1367_v51  ;;  %v223_v43 = vld [vmem:[#allocation10 + $0x1a8] sm:$0xff]  ;;  %v221_v44 = vld [vmem:[#allocation10 + $0x198] sm:$0xff]  ;;  %v1385_v46 = vpack.c.bf16 %v214_v38, %v210_v37  ;;  %v218_v47 = vld [vmem:[#allocation10 + $0x180] sm:$0xff]  ;;  %v1417_v48 = vpack.c.bf16 %v216_v41, %v212_v39 }
  0xa4   :  { %1400 = vmatprep.subr.bf16.mxu1 %v1399_v55  ;;  %504 = vmatprep.mubr.f32.mxu0 %v1863_v7  ;;  %v225_v45 = vld [vmem:[#allocation10 + $0x1b8] sm:$0xff]  ;;  %v1387_v49 = vpack.c.bf16 %v223_v43, %v219_v42  ;;  %v222_v50 = vld [vmem:[#allocation10 + $0x1a0] sm:$0xff]  ;;  %v220_v51 = vld [vmem:[#allocation10 + $0x190] sm:$0xff] }
  0xa5   :  { %575 = vmatprep.mubr.f32.mxu1 %v1863_v7  ;;  %v224_v52 = vld [vmem:[#allocation10 + $0x1b0] sm:$0xff]  ;;  %v1419_v53 = vpack.c.bf16 %v225_v45, %v221_v44  ;;  %v227_v54 = vld [vmem:[#allocation10 + $0x1c8] sm:$0xff]  ;;  %v229_v56 = vld [vmem:[#allocation10 + $0x1d8] sm:$0xff]  ;;  %v1389_v60 = vpack.c.bf16 %v222_v50, %v218_v47 }
  0xa6   :  { %1370 = vmatpush1.bf16.msra.mxu0 %v1369_v61  ;;  %v231_v55 = vld [vmem:[#allocation10 + $0x1e8] sm:$0xff]  ;;  %v233_v57 = vld [vmem:[#allocation10 + $0x1f8] sm:$0xff]  ;;  %v226_v61 = vld [vmem:[#allocation10 + $0x1c0] sm:$0xff] }
  0xa7   :  { %1402 = vmatpush1.bf16.msra.mxu1 %v1401_v62  ;;  %1372 = vmatprep.subr.bf16.mxu0 %v1371_v63  ;;  %v132_v58 = vld [vmem:[%s131_s16] sm:$0x1]  ;;  %v1421_v62 = vpack.c.bf16 %v224_v52, %v220_v51  ;;  %v1391_v63 = vpack.c.bf16 %v231_v55, %v227_v54  ;;  %v230_v0 = vld [vmem:[#allocation10 + $0x1e0] sm:$0xff]  ;;  %v228_v1 = vld [vmem:[#allocation10 + $0x1d0] sm:$0xff] }
  0xa8   :  { %1404 = vmatprep.subr.bf16.mxu1 %v1403_v3  ;;  %v1240_v59 = vld [vmem:[%s134_s17] ss:$0 sm:$0xff]  ;;  %v232_v2 = vld [vmem:[#allocation10 + $0x1f0] sm:$0xff]  ;;  %v1423_v3 = vpack.c.bf16 %v233_v57, %v229_v56  ;;  %v696_v6 = vld [vmem:[#allocation12 + $0x208] sm:$0xff] }
  0xa9   :  { %v1241_v4 = vld [vmem:[%s137_s0] ss:$0 sm:$0xff]  ;;  %v161_v5 = vsel %vm160_vm0, %v132_v58, %v1240_v59  ;;  %v700_v8 = vld [vmem:[#allocation12 + $0x228] sm:$0xff]  ;;  %v1425_v13 = vpack.c.bf16 %v232_v2, %v228_v1  ;;  %v699_v17 = vld [vmem:[#allocation12 + $0x220] sm:$0xff] }
  0xaa   :  { %1374 = vmatpush1.bf16.msra.mxu0 %v1373_v10  ;;  %v698_v9 = vld [vmem:[#allocation12 + $0x218] sm:$0xff]  ;;  %v163_v14 = vsel %vm162_vm1, %v161_v5, %v1241_v4  ;;  %v1427_v15 = vpack.c.bf16 %v700_v8, %v696_v6  ;;  %v697_v18 = vld [vmem:[#allocation12 + $0x210] sm:$0xff]  ;;  %v704_v21 = vld [vmem:[#allocation12 + $0x248] sm:$0xff] }
  0xab   :  { %1406 = vmatpush1.bf16.msra.mxu1 %v1405_v11  ;;  %1376 = vmatprep.subr.bf16.mxu0 %v1375_v12  ;;  %v702_v10 = vld [vmem:[#allocation12 + $0x238] sm:$0xff]  ;;  %v1393_v11 = vpack.c.bf16 %v230_v0, %v226_v61  ;;  %v701_v20 = vld [vmem:[#allocation12 + $0x230] sm:$0xff]  ;;  %v703_v29 = vld [vmem:[#allocation12 + $0x240] sm:$0xff] }
  0xac   :  { %1408 = vmatprep.subr.bf16.mxu1 %v1407_v16  ;;  %v1242_v12 = vld [vmem:[%s140_s27] ss:$0 sm:$0xff]  ;;  %v695_v16 = vld [vmem:[#allocation12 + $0x200] sm:$0xff]  ;;  %v1459_v19 = vpack.c.bf16 %v702_v10, %v698_v9  ;;  %v1461_v27 = vpack.c.bf16 %v701_v20, %v697_v18  ;;  %v705_v31 = vld [vmem:[#allocation12 + $0x250] sm:$0xff] }
  0xad   :  { %v165_v25 = vsel %vm164_vm2, %v163_v14, %v1242_v12  ;;  %v1429_v26 = vpack.c.bf16 %v699_v17, %v695_v16  ;;  %v707_v30 = vld [vmem:[#allocation12 + $0x260] sm:$0xff]  ;;  %v709_v33 = vld [vmem:[#allocation12 + $0x270] sm:$0xff]  ;;  %v718_v37 = vld [vmem:[#allocation12 + $0x2b8] sm:$0xff] }
  0xae   :  { %1378 = vmatpush1.bf16.msra.mxu0 %v1377_v22  ;;  %v708_v22 = vld [vmem:[#allocation12 + $0x268] sm:$0xff]  ;;  %v1433_v38 = vpack.c.bf16 %v707_v30, %v703_v29  ;;  %v1465_v39 = vpack.c.bf16 %v709_v33, %v705_v31  ;;  %v711_v41 = vld [vmem:[#allocation12 + $0x280] sm:$0xff]  ;;  %v713_v43 = vld [vmem:[#allocation12 + $0x290] sm:$0xff] }
  0xaf   :  { %1410 = vmatpush1.bf16.msra.mxu1 %v1409_v23  ;;  %1380 = vmatprep.subr.bf16.mxu0 %v1379_v24  ;;  %v706_v23 = vld [vmem:[#allocation12 + $0x258] sm:$0xff]  ;;  %v715_v42 = vld [vmem:[#allocation12 + $0x2a0] sm:$0xff]  ;;  %v717_v45 = vld [vmem:[#allocation12 + $0x2b0] sm:$0xff] }
  0xb0   :  { %1412 = vmatprep.subr.bf16.mxu1 %v1411_v28  ;;  %v710_v24 = vld [vmem:[#allocation12 + $0x278] sm:$0xff]  ;;  %v1431_v28 = vpack.c.bf16 %v708_v22, %v704_v21  ;;  %v724_v47 = vld [vmem:[#allocation12 + $0x2e8] sm:$0xff]  ;;  %v1437_v50 = vpack.c.bf16 %v715_v42, %v711_v41  ;;  %v1469_v51 = vpack.c.bf16 %v717_v45, %v713_v43  ;;  %v723_v54 = vld [vmem:[#allocation12 + $0x2e0] sm:$0xff] }
  0xb1   :  { %v1463_v32 = vpack.c.bf16 %v710_v24, %v706_v23  ;;  %v721_v55 = vld [vmem:[#allocation12 + $0x2d0] sm:$0xff]  ;;  %v728_v58 = vld [vmem:[#allocation12 + $0x308] sm:$0xff]  ;;  %v734_v61 = vld [vmem:[#allocation12 + $0x338] sm:$0xff] }
  0xb2   :  { %1382 = vmatpush1.bf16.msra.mxu0 %v1381_v34  ;;  %v712_v34 = vld [vmem:[#allocation12 + $0x288] sm:$0xff]  ;;  %v725_v57 = vld [vmem:[#allocation12 + $0x2f0] sm:$0xff]  ;;  %v727_v1 = vld [vmem:[#allocation12 + $0x300] sm:$0xff] }
  0xb3   :  { %1414 = vmatpush1.bf16.msra.mxu1 %v1413_v35  ;;  %1384 = vmatprep.subr.bf16.mxu0 %v1383_v36  ;;  %v716_v35 = vld [vmem:[#allocation12 + $0x2a8] sm:$0xff]  ;;  %v714_v36 = vld [vmem:[#allocation12 + $0x298] sm:$0xff]  ;;  %v731_v2 = vld [vmem:[#allocation12 + $0x320] sm:$0xff] }
  0xb4   :  { %1416 = vmatprep.subr.bf16.mxu1 %v1415_v40  ;;  %v1435_v40 = vpack.c.bf16 %v716_v35, %v712_v34  ;;  %v1467_v44 = vpack.c.bf16 %v718_v37, %v714_v36  ;;  %v732_v59 = vld [vmem:[#allocation12 + $0x328] sm:$0xff]  ;;  %v733_v5 = vld [vmem:[#allocation12 + $0x330] sm:$0xff]  ;;  %v738_v9 = vld [vmem:[#allocation12 + $0x358] sm:$0xff] }
  0xb5   :  { %v1443_v0 = vpack.c.bf16 %v732_v59, %v728_v58  ;;  %v736_v6 = vld [vmem:[#allocation12 + $0x348] sm:$0xff]  ;;  %v742_v10 = vld [vmem:[#allocation12 + $0x378] sm:$0xff]  ;;  %v735_v14 = vld [vmem:[#allocation12 + $0x340] sm:$0xff] }
  0xb6   :  { %1386 = vmatpush1.bf16.msra.mxu0 %v1385_v46  ;;  %v720_v46 = vld [vmem:[#allocation12 + $0x2c8] sm:$0xff]  ;;  %v737_v16 = vld [vmem:[#allocation12 + $0x350] sm:$0xff]  ;;  %v1479_v17 = vpack.c.bf16 %v742_v10, %v738_v9  ;;  %v746_v21 = vld [vmem:[#allocation12 + $0x398] sm:$0xff] }
  0xb7   :  { %1418 = vmatpush1.bf16.msra.mxu1 %v1417_v48  ;;  %1388 = vmatprep.subr.bf16.mxu0 %v1387_v49  ;;  %v722_v48 = vld [vmem:[#allocation12 + $0x2d8] sm:$0xff]  ;;  %v1439_v52 = vpack.c.bf16 %v724_v47, %v720_v46  ;;  %v740_v8 = vld [vmem:[#allocation12 + $0x368] sm:$0xff]  ;;  %v741_v18 = vld [vmem:[#allocation12 + $0x370] sm:$0xff] }
  0xb8   :  { %1420 = vmatprep.subr.bf16.mxu1 %v1419_v53  ;;  %v726_v49 = vld [vmem:[#allocation12 + $0x2f8] sm:$0xff]  ;;  %v719_v53 = vld [vmem:[#allocation12 + $0x2c0] sm:$0xff]  ;;  %v748_v20 = vld [vmem:[#allocation12 + $0x3a8] sm:$0xff]  ;;  %v1481_v24 = vpack.c.bf16 %v741_v18, %v737_v16 }
  0xb9   :  { %v1471_v56 = vpack.c.bf16 %v726_v49, %v722_v48  ;;  %v750_v22 = vld [vmem:[#allocation12 + $0x3b8] sm:$0xff]  ;;  %v745_v29 = vld [vmem:[#allocation12 + $0x390] sm:$0xff]  ;;  %v752_v33 = vld [vmem:[#allocation12 + $0x3c8] sm:$0xff] }
  0xba   :  { %1390 = vmatpush1.bf16.msra.mxu0 %v1389_v60  ;;  %v730_v60 = vld [vmem:[#allocation12 + $0x318] sm:$0xff]  ;;  %v749_v30 = vld [vmem:[#allocation12 + $0x3b0] sm:$0xff]  ;;  %v756_v34 = vld [vmem:[#allocation12 + $0x3e8] sm:$0xff] }
  0xbb   :  { %1422 = vmatpush1.bf16.msra.mxu1 %v1421_v62  ;;  %1392 = vmatprep.subr.bf16.mxu0 %v1391_v63  ;;  %v1441_v62 = vpack.c.bf16 %v723_v54, %v719_v53  ;;  %v1473_v63 = vpack.c.bf16 %v725_v57, %v721_v55  ;;  %v1475_v4 = vpack.c.bf16 %v734_v61, %v730_v60  ;;  %v754_v35 = vld [vmem:[#allocation12 + $0x3d8] sm:$0xff]  ;;  %v753_v41 = vld [vmem:[#allocation12 + $0x3d0] sm:$0xff]  ;;  %v631_v45 = vld [vmem:[#allocation10 + $0x208] sm:$0xff] }
  0xbc   :  { %1424 = vmatprep.subr.bf16.mxu1 %v1423_v3  ;;  %v729_v3 = vld [vmem:[#allocation12 + $0x310] sm:$0xff]  ;;  %v1455_v36 = vpack.c.bf16 %v756_v34, %v752_v33  ;;  %v758_v37 = vld [vmem:[#allocation12 + $0x3f8] sm:$0xff]  ;;  %v635_v46 = vld [vmem:[#allocation10 + $0x228] sm:$0xff] }
  0xbd   :  { %v1477_v12 = vpack.c.bf16 %v733_v5, %v729_v3  ;;  %v757_v43 = vld [vmem:[#allocation12 + $0x3f0] sm:$0xff]  ;;  %v633_v47 = vld [vmem:[#allocation10 + $0x218] sm:$0xff]  ;;  %v1491_v48 = vpack.c.bf16 %v635_v46, %v631_v45  ;;  %v639_v58 = vld [vmem:[#allocation10 + $0x248] sm:$0xff] }
  0xbe   :  { %1394 = vmatpush1.bf16.msra.mxu0 %v1393_v11  ;;  %v1445_v11 = vpack.c.bf16 %v731_v2, %v727_v1  ;;  %v637_v49 = vld [vmem:[#allocation10 + $0x238] sm:$0xff]  ;;  %v632_v54 = vld [vmem:[#allocation10 + $0x210] sm:$0xff]  ;;  %v643_v59 = vld [vmem:[#allocation10 + $0x268] sm:$0xff] }
  0xbf   :  { %1426 = vmatpush1.bf16.msra.mxu1 %v1425_v13  ;;  %1428 = vmatprep.subr.bf16.mxu0 %v1427_v15  ;;  %v1447_v13 = vpack.c.bf16 %v740_v8, %v736_v6  ;;  %v739_v15 = vld [vmem:[#allocation12 + $0x360] sm:$0xff]  ;;  %v636_v55 = vld [vmem:[#allocation10 + $0x230] sm:$0xff]  ;;  %v641_v60 = vld [vmem:[#allocation10 + $0x258] sm:$0xff]  ;;  %v1495_v61 = vpack.c.bf16 %v643_v59, %v639_v58 }
  0xc0   :  { %1460 = vmatprep.subr.bf16.mxu1 %v1459_v19  ;;  %v744_v19 = vld [vmem:[#allocation12 + $0x388] sm:$0xff]  ;;  %v1449_v23 = vpack.c.bf16 %v739_v15, %v735_v14  ;;  %v1525_v57 = vpack.c.bf16 %v636_v55, %v632_v54  ;;  %v640_v3 = vld [vmem:[#allocation10 + $0x250] sm:$0xff]  ;;  %v649_v9 = vld [vmem:[#allocation10 + $0x298] sm:$0xff] }
  0xc1   :  { %1243 = vmatmul.mubr.msk.f32.vlgmr.msra.gmra.mrb[0].mxu0 %vm166_vm3, %v165_v25  ;;  %v647_v6 = vld [vmem:[#allocation10 + $0x288] sm:$0xff]  ;;  %v648_v16 = vld [vmem:[#allocation10 + $0x290] sm:$0xff]  ;;  %v665_v33 = vld [vmem:[#allocation10 + $0x318] sm:$0xff] }
  0xc2   :  { %1244 = vmatmul.mubr.msk.f32.vlgmr.msra.gmra.mrb[0].mxu1 %vm166_vm3, %v165_v25  ;;  %1430 = vmatpush1.bf16.msra.mxu0 %v1429_v26  ;;  %v1451_v25 = vpack.c.bf16 %v748_v20, %v744_v19  ;;  %v743_v26 = vld [vmem:[#allocation12 + $0x380] sm:$0xff]  ;;  %v651_v8 = vld [vmem:[#allocation10 + $0x2a8] sm:$0xff]  ;;  %v673_v45 = vld [vmem:[#allocation10 + $0x358] sm:$0xff] }
  0xc3   :  { %1462 = vmatpush1.bf16.msra.mxu1 %v1461_v27  ;;  %1432 = vmatprep.subr.bf16.mxu0 %v1431_v28  ;;  %v747_v27 = vld [vmem:[#allocation12 + $0x3a0] sm:$0xff]  ;;  %v1483_v28 = vpack.c.bf16 %v750_v22, %v746_v21  ;;  %v1499_v10 = vpack.c.bf16 %v651_v8, %v647_v6  ;;  %v655_v19 = vld [vmem:[#allocation10 + $0x2c8] sm:$0xff]  ;;  %v657_v21 = vld [vmem:[#allocation10 + $0x2d8] sm:$0xff] }
  0xc4   :  { %1464 = vmatprep.subr.bf16.mxu1 %v1463_v32  ;;  %823 = vmatprep.mubr.f32.mxu0 %v1863_v7  ;;  %v1453_v31 = vpack.c.bf16 %v747_v27, %v743_v26  ;;  %v1485_v32 = vpack.c.bf16 %v749_v30, %v745_v29  ;;  %v659_v20 = vld [vmem:[#allocation10 + $0x2e8] sm:$0xff]  ;;  %v658_v26 = vld [vmem:[#allocation10 + $0x2e0] sm:$0xff]  ;;  %v656_v27 = vld [vmem:[#allocation10 + $0x2d0] sm:$0xff] }
  0xc5   :  { %894 = vmatprep.mubr.f32.mxu1 %v1863_v7  ;;  %v1503_v22 = vpack.c.bf16 %v659_v20, %v655_v19  ;;  %v679_v55 = vld [vmem:[#allocation10 + $0x388] sm:$0xff]  ;;  %v685_v59 = vld [vmem:[#allocation10 + $0x3b8] sm:$0xff] }
  0xc6   :  { %1434 = vmatpush1.bf16.msra.mxu0 %v1433_v38  ;;  %v1487_v38 = vpack.c.bf16 %v758_v37, %v754_v35  ;;  %v669_v35 = vld [vmem:[#allocation10 + $0x338] sm:$0xff]  ;;  %v666_v37 = vld [vmem:[#allocation10 + $0x320] sm:$0xff] }
  0xc7   :  { %1466 = vmatpush1.bf16.msra.mxu1 %v1465_v39  ;;  %1436 = vmatprep.subr.bf16.mxu0 %v1435_v40  ;;  %v751_v39 = vld [vmem:[#allocation12 + $0x3c0] sm:$0xff]  ;;  %v693_v8 = vld [vmem:[#allocation10 + $0x3f8] sm:$0xff] }
  0xc8   :  { %1468 = vmatprep.subr.bf16.mxu1 %v1467_v44  ;;  %v755_v40 = vld [vmem:[#allocation12 + $0x3e0] sm:$0xff]  ;;  %v1489_v44 = vpack.c.bf16 %v757_v43, %v753_v41  ;;  %v668_v41 = vld [vmem:[#allocation10 + $0x330] sm:$0xff]  ;;  %v671_v43 = vld [vmem:[#allocation10 + $0x348] sm:$0xff] }
  0xc9   :  { %v1457_v42 = vpack.c.bf16 %v755_v40, %v751_v39  ;;  %v664_v40 = vld [vmem:[#allocation10 + $0x310] sm:$0xff]  ;;  %v582_v19 = vld [vmem:[%s2138_s6] sm:$0xf] }
  0xca   :  { %1438 = vmatpush1.bf16.msra.mxu0 %v1437_v50  ;;  %v630_v50 = vld [vmem:[#allocation10 + $0x200] sm:$0xff] }
  0xcb   :  { %1470 = vmatpush1.bf16.msra.mxu1 %v1469_v51  ;;  %1440 = vmatprep.subr.bf16.mxu0 %v1439_v52  ;;  %v634_v51 = vld [vmem:[#allocation10 + $0x220] sm:$0xff]  ;;  %v1523_v52 = vpack.c.bf16 %v637_v49, %v633_v47  ;;  %v677_v47 = vld [vmem:[#allocation10 + $0x378] sm:$0xff] }
  0xcc   :  { %1472 = vmatprep.subr.bf16.mxu1 %v1471_v56  ;;  %v1493_v53 = vpack.c.bf16 %v634_v51, %v630_v50  ;;  %v626_v56 = vld [vmem:[#allocation2 + $0x8] sm:$0xff]  ;;  %v674_v49 = vld [vmem:[#allocation10 + $0x360] sm:$0xff]  ;;  %v1543_v50 = vpack.c.bf16 %v677_v47, %v673_v45 }
  0xce   :  { %1442 = vmatpush1.bf16.msra.mxu0 %v1441_v62  ;;  %v645_v62 = vld [vmem:[#allocation10 + $0x278] sm:$0xff] }
  0xcf   :  { %1474 = vmatpush1.bf16.msra.mxu1 %v1473_v63  ;;  %1444 = vmatprep.subr.bf16.mxu0 %v1443_v0  ;;  %v638_v63 = vld [vmem:[#allocation10 + $0x240] sm:$0xff]  ;;  %v1527_v1 = vpack.c.bf16 %v645_v62, %v641_v60 }
  0xd0   :  { %1476 = vmatprep.subr.bf16.mxu1 %v1475_v4  ;;  %v642_v0 = vld [vmem:[#allocation10 + $0x260] sm:$0xff]  ;;  %v644_v4 = vld [vmem:[#allocation10 + $0x270] sm:$0xff] }
  0xd1   :  { %v1497_v2 = vpack.c.bf16 %v642_v0, %v638_v63  ;;  %v1529_v5 = vpack.c.bf16 %v644_v4, %v640_v3  ;;  %v678_v60 = vld [vmem:[#allocation10 + $0x380] sm:$0xff]  ;;  %v680_v0 = vld [vmem:[#allocation10 + $0x390] sm:$0xff]  ;;  %v687_v3 = vld [vmem:[#allocation10 + $0x3c8] sm:$0xff] }
  0xd2   :  { %1446 = vmatpush1.bf16.msra.mxu0 %v1445_v11  ;;  %v653_v11 = vld [vmem:[#allocation10 + $0x2b8] sm:$0xff]  ;;  %v691_v4 = vld [vmem:[#allocation10 + $0x3e8] sm:$0xff] }
  0xd3   :  { %1478 = vmatpush1.bf16.msra.mxu1 %v1477_v12  ;;  %1448 = vmatprep.subr.bf16.mxu0 %v1447_v13  ;;  %v646_v12 = vld [vmem:[#allocation10 + $0x280] sm:$0xff]  ;;  %v1531_v14 = vpack.c.bf16 %v653_v11, %v649_v9  ;;  %v1519_v6 = vpack.c.bf16 %v691_v4, %v687_v3  ;;  %v1099_v3 = vld [vmem:[#allocation13 + $0x50] sm:$0xff]  ;;  %v1100_v4 = vld [vmem:[#allocation13 + $0x58] sm:$0xff] }
  0xd4   :  { %1480 = vmatprep.subr.bf16.mxu1 %v1479_v17  ;;  %v650_v13 = vld [vmem:[#allocation10 + $0x2a0] sm:$0xff]  ;;  %v652_v17 = vld [vmem:[#allocation10 + $0x2b0] sm:$0xff] }
  0xd5   :  { %v1501_v15 = vpack.c.bf16 %v650_v13, %v646_v12  ;;  %v1533_v18 = vpack.c.bf16 %v652_v17, %v648_v16  ;;  %v686_v9 = vld [vmem:[#allocation10 + $0x3c0] sm:$0xff]  ;;  %v688_v13 = vld [vmem:[#allocation10 + $0x3d0] sm:$0xff]  ;;  %v584_v16 = vlaneseq }
  0xd6   :  { %1450 = vmatpush1.bf16.msra.mxu0 %v1449_v23  ;;  %v661_v23 = vld [vmem:[#allocation10 + $0x2f8] sm:$0xff] }
  0xd7   :  { %1482 = vmatpush1.bf16.msra.mxu1 %v1481_v24  ;;  %1452 = vmatprep.subr.bf16.mxu0 %v1451_v25  ;;  %v654_v24 = vld [vmem:[#allocation10 + $0x2c0] sm:$0xff]  ;;  %v1535_v25 = vpack.c.bf16 %v661_v23, %v657_v21  ;;  %v2058_v17 = vshrl.u32 %v584_v16, 7 }
  0xd8   :  { %1484 = vmatprep.subr.bf16.mxu1 %v1483_v28  ;;  %v660_v28 = vld [vmem:[#allocation10 + $0x2f0] sm:$0xff]  ;;  %v1505_v29 = vpack.c.bf16 %v658_v26, %v654_v24 }
  0xd9   :  { %v1537_v30 = vpack.c.bf16 %v660_v28, %v656_v27  ;;  %v590_v20 = vsub.s32 1, %v2058_v17  ;;  %v594_v21 = vsub.s32 2, %v2058_v17 }
  0xda   :  { %1454 = vmatpush1.bf16.msra.mxu0 %v1453_v31  ;;  %v663_v31 = vld [vmem:[#allocation10 + $0x308] sm:$0xff] }
  0xdb   :  { %1486 = vmatpush1.bf16.msra.mxu1 %v1485_v32  ;;  %1456 = vmatprep.subr.bf16.mxu0 %v1455_v36  ;;  %v667_v32 = vld [vmem:[#allocation10 + $0x328] sm:$0xff]  ;;  %v662_v36 = vld [vmem:[#allocation10 + $0x300] sm:$0xff]  ;;  %v591_v23 = vrot.slane %v582_v19, %v590_v20  ;;  %v595_v24 = vrot.slane %v582_v19, %v594_v21 }
  0xdc   :  { %1488 = vmatprep.subr.bf16.mxu1 %v1487_v38  ;;  %v1507_v34 = vpack.c.bf16 %v667_v32, %v663_v31  ;;  %v1539_v38 = vpack.c.bf16 %v669_v35, %v665_v33  ;;  %v1509_v39 = vpack.c.bf16 %v666_v37, %v662_v36  ;;  %v598_v32 = vsub.s32 3, %v2058_v17 }
  0xde   :  { %1458 = vmatpush1.bf16.msra.mxu0 %v1457_v42  ;;  %v1541_v42 = vpack.c.bf16 %v668_v41, %v664_v40  ;;  %v599_v33 = vrot.slane %v582_v19, %v598_v32  ;;  %v169_v41 = vld [vmem:[#allocation6] sm:$0xff] }
  0xdf   :  { %1490 = vmatpush1.bf16.msra.mxu1 %v1489_v44  ;;  %1492 = vmatprep.subr.bf16.mxu0 %v1491_v48  ;;  %v675_v44 = vld [vmem:[#allocation10 + $0x368] sm:$0xff]  ;;  %v670_v48 = vld [vmem:[#allocation10 + $0x340] sm:$0xff] }
  0xe0   :  { %1524 = vmatprep.subr.bf16.mxu1 %v1523_v52  ;;  %v1511_v46 = vpack.c.bf16 %v675_v44, %v671_v43  ;;  %v1513_v51 = vpack.c.bf16 %v674_v49, %v670_v48  ;;  %v672_v52 = vld [vmem:[#allocation10 + $0x350] sm:$0xff] }
  0xe1   :  { %824 = vmatmul.mubr.f32.vlgmr.msra.gmra.mrb[2].mxu0 %v626_v56 }
  0xe2   :  { %895 = vmatmul.mubr.f32.vlgmr.msra.gmra.mrb[2].mxu1 %v626_v56  ;;  %1494 = vmatpush1.bf16.msra.mxu0 %v1493_v53  ;;  %v676_v53 = vld [vmem:[#allocation10 + $0x370] sm:$0xff]  ;;  %v683_v56 = vld [vmem:[#allocation10 + $0x3a8] sm:$0xff] }
  0xe3   :  { %1526 = vmatpush1.bf16.msra.mxu1 %v1525_v57  ;;  %965 = vmatprep.mubr.f32.mxu0 %v1863_v7  ;;  %v1545_v54 = vpack.c.bf16 %v676_v53, %v672_v52  ;;  %v681_v57 = vld [vmem:[#allocation10 + $0x398] sm:$0xff]  ;;  %v1515_v58 = vpack.c.bf16 %v683_v56, %v679_v55  ;;  %v1090_v52 = vld [vmem:[#allocation13 + $0x8] sm:$0xff]  ;;  %v1091_v55 = vld [vmem:[#allocation13 + $0x10] sm:$0xff] }
  0xe4   :  { %1496 = vmatprep.subr.bf16.mxu0 %v1495_v61  ;;  %1036 = vmatprep.mubr.f32.mxu1 %v1863_v7  ;;  %v682_v61 = vld [vmem:[#allocation10 + $0x3a0] sm:$0xff]  ;;  %v1547_v62 = vpack.c.bf16 %v685_v59, %v681_v57  ;;  %v1092_v56 = vld [vmem:[#allocation13 + $0x18] sm:$0xff]  ;;  %v1094_v59 = vld [vmem:[#allocation13 + $0x28] sm:$0xff] }
  0xe5   :  { %1528 = vmatprep.subr.bf16.mxu1 %v1527_v1  ;;  %v1517_v63 = vpack.c.bf16 %v682_v61, %v678_v60  ;;  %v684_v1 = vld [vmem:[#allocation10 + $0x3b0] sm:$0xff]  ;;  %v1559_v57 = vpack.c.bf16 %v1092_v56, %v1091_v55 }
  0xe6   :  { %1498 = vmatpush1.bf16.msra.mxu0 %v1497_v2  ;;  %v1549_v2 = vpack.c.bf16 %v684_v1, %v680_v0  ;;  %v1095_v61 = vld [vmem:[#allocation13 + $0x30] sm:$0xff]  ;;  %v1097_v0 = vld [vmem:[#allocation13 + $0x40] sm:$0xff]  ;;  %v1098_v1 = vld [vmem:[#allocation13 + $0x48] sm:$0xff] }
  0xe7   :  { %1530 = vmatpush1.bf16.msra.mxu1 %v1529_v5  ;;  %1500 = vmatprep.subr.bf16.mxu0 %v1499_v10  ;;  %v689_v5 = vld [vmem:[#allocation10 + $0x3d8] sm:$0xff]  ;;  %v690_v10 = vld [vmem:[#allocation10 + $0x3e0] sm:$0xff] }
  0xe8   :  { %1532 = vmatprep.subr.bf16.mxu1 %v1531_v14  ;;  %v1551_v11 = vpack.c.bf16 %v693_v8, %v689_v5  ;;  %v1521_v12 = vpack.c.bf16 %v690_v10, %v686_v9  ;;  %v692_v14 = vld [vmem:[#allocation10 + $0x3f0] sm:$0xff]  ;;  %v1571_v5 = vpack.c.bf16 %v1100_v4, %v1099_v3  ;;  %v1102_v8 = vld [vmem:[#allocation13 + $0x68] sm:$0xff] }
  0xe9   :  { %v1103_v10 = vld [vmem:[#allocation13 + $0x70] sm:$0xff] }
  0xea   :  { %1502 = vmatpush1.bf16.msra.mxu0 %v1501_v15  ;;  %v1553_v15 = vpack.c.bf16 %v692_v14, %v688_v13  ;;  %v1245_v13 = vld [vmem:[%s2138_s6 + $0x4] sm:$0xf]  ;;  %s1866_s6 = smov [#allocation16]  }
  0xeb   :  { %1534 = vmatpush1.bf16.msra.mxu1 %v1533_v18  ;;  %1504 = vmatprep.subr.bf16.mxu0 %v1503_v22  ;;  %v586_v18 = vsub.s32 0, %v2058_v17  ;;  %v1057_v16 = vrot.slane %v1245_v13, %v594_v21  ;;  %s1198_s12 = sshll.u32 %s1866_s6, 4  ;;  %s1199_s12 = int_to_ptr.vmem [resolvable:$true] %s1198_s12 }
  0xec   :  { %1536 = vmatprep.subr.bf16.mxu1 %v1535_v25  ;;  %s1768_s20 = scalar_lea.vmem %s1199_s12, 256  ;;  %p1773_p10 = scmp.lt.s32.totalorder %s1199_s12, %s1199_s12 }
  0xed   :  { %v587_v22 = vrot.slane %v582_v19, %v586_v18  ;;  %v1049_v14 = vrot.slane %v1245_v13, %v586_v18  ;;  %p1769_p9 = scmp.ne.s32.totalorder %s1199_s12, %s1768_s20  ;;  %p1774_p11 = scmp.lt.s32.totalorder %s1768_s20, %s1768_s20 }
  0xee   :  { %1506 = vmatpush1.bf16.msra.mxu0 %v1505_v29 }
  0xef   :  { %1538 = vmatpush1.bf16.msra.mxu1 %v1537_v30  ;;  %1508 = vmatprep.subr.bf16.mxu0 %v1507_v34  ;;  %p1775_p12 = por %p1774_p11, %p1773_p10 }
  0xf0   :  { %1540 = vmatprep.subr.bf16.mxu1 %v1539_v38 }
  0xf1   :  { %p1776_p13 = pnand %p1775_p12, %p1769_p9 }
  0xf2   :  { %1510 = vmatpush1.bf16.msra.mxu0 %v1509_v39 }
  0xf3   :  { %1542 = vmatpush1.bf16.msra.mxu1 %v1541_v42  ;;  %1512 = vmatprep.subr.bf16.mxu0 %v1511_v46 }
  0xf4   :  { %1544 = vmatprep.subr.bf16.mxu1 %v1543_v50 }
  0xf6   :  { %1514 = vmatpush1.bf16.msra.mxu0 %v1513_v51  ;;  %v1089_v51 = vld [vmem:[#allocation13] sm:$0xff] }
  0xf7   :  { %1546 = vmatpush1.bf16.msra.mxu1 %v1545_v54  ;;  %1516 = vmatprep.subr.bf16.mxu0 %v1515_v58  ;;  %v1556_v53 = vpack.c.bf16 %v1090_v52, %v1089_v51  ;;  %v1864_v54 = vmov 0.0|0.0   ;;  %v1093_v58 = vld [vmem:[#allocation13 + $0x20] sm:$0xff] }
  0xf8   :  { %1548 = vmatprep.subr.bf16.mxu1 %v1547_v62  ;;  %v1562_v60 = vpack.c.bf16 %v1094_v59, %v1093_v58  ;;  %v1096_v62 = vld [vmem:[#allocation13 + $0x38] sm:$0xff] }
  0xfa   :  { %1518 = vmatpush1.bf16.msra.mxu0 %v1517_v63  ;;  %v1565_v63 = vpack.c.bf16 %v1096_v62, %v1095_v61 }
  0xfb   :  { %1550 = vmatpush1.bf16.msra.mxu1 %v1549_v2  ;;  %1520 = vmatprep.subr.bf16.mxu0 %v1519_v6  ;;  %v1568_v2 = vpack.c.bf16 %v1098_v1, %v1097_v0  ;;  %v1101_v6 = vld [vmem:[#allocation13 + $0x60] sm:$0xff] }
  0xfc   :  { %1552 = vmatprep.subr.bf16.mxu1 %v1551_v11  ;;  %v1574_v9 = vpack.c.bf16 %v1102_v8, %v1101_v6  ;;  %v1104_v11 = vld [vmem:[#allocation13 + $0x78] sm:$0xff] }
  0xfe   :  { %1522 = vmatpush1.bf16.msra.mxu0 %v1521_v12  ;;  %v1577_v12 = vpack.c.bf16 %v1104_v11, %v1103_v10 }
  0xff   :  { %1554 = vmatpush1.bf16.msra.mxu1 %v1553_v15  ;;  %1555 = vmatprep.subr.bf16.mxu0 %v1864_v54  ;;  %v1053_v15 = vrot.slane %v1245_v13, %v590_v20 }
 0x194   :  { %v506_v25 = vpop.f32.mrb[0].mxu0 }
 0x195   :  { %v604_v26 = vadd.f32 %v587_v22, %v506_v25  ;;  %v577_v27 = vpop.f32.mrb[0].mxu1  ;;  %v508_v28 = vpop.f32.mrb[1].mxu0 }
 0x196   :  { %v605_v29 = vadd.f32 %v591_v23, %v508_v28  ;;  %v579_v30 = vpop.f32.mrb[1].mxu1  ;;  %v606_v31 = vadd.f32 %v595_v24, %v577_v27  ;;  %v1061_v27 = vrot.slane %v1245_v13, %v598_v32 }
 0x197   :  { %1606 = vtanh.f32 %v604_v26  ;;  %v607_v34 = vadd.f32 %v599_v33, %v579_v30  ;;  %v628_v33 = vld [vmem:[#allocation6 + $0x8] sm:$0xff] }
 0x198   :  { %1608 = vtanh.f32 %v605_v29 }
 0x199   :  { %1610 = vtanh.f32 %v606_v31 }
 0x19a   :  { %1612 = vtanh.f32 %v607_v34 }
 0x1a1   :  { %v1607_v35 = vpop.eup %1606 }
 0x1a2   :  { %v612_v36 = vadd.f32 1.0, %v1607_v35  ;;  %v1609_v37 = vpop.eup %1608 }
 0x1a3   :  { %v614_v39 = vadd.f32 1.0, %v1609_v37  ;;  %v1611_v40 = vpop.eup %1610 }
 0x1a4   :  { %v613_v38 = vmul.f32 0.5, %v612_v36  ;;  %v1613_v46 = vpop.eup %1612 }
 0x1a5   :  { %v615_v42 = vmul.f32 0.5, %v614_v39  ;;  %v616_v47 = vadd.f32 1.0, %v1613_v46 }
 0x1a6   :  { %v619_v43 = vmul.f32 %v1611_v40, %v613_v38 }
 0x1a7   :  { %v618_v44 = vmul.f32 %v615_v42, %v169_v41  ;;  %v617_v48 = vmul.f32 0.5, %v616_v47 }
 0x1a9   :  { %v620_v45 = vadd.f32 %v619_v43, %v618_v44 }
 0x1ab   :  { %1614 = vtanh.f32 %v620_v45  ;;  %624 = vst [vmem:[#allocation18] sm:$0xff] %v620_v45 }
 0x1b5   :  { %v1615_v49 = vpop.eup %1614 }
 0x1b6   :  { %v622_v50 = vmul.f32 %v1615_v49, %v617_v48 }
 0x1b8   :  { %623 = vst [vmem:[#allocation16] sm:$0xff] %v622_v50  ;;  %966 = vmatmul.mubr.f32.vlgmr.msra.gmra.mrb[2].mxu0 %v622_v50  ;;  %1037 = vmatmul.mubr.f32.vlgmr.msra.gmra.mrb[2].mxu1 %v622_v50 }
 0x1b9   :  { %1557 = vmatpush3.bf16.msra.mxu0 %v1556_v53  ;;  %1296 = vmatprep.mubr.msk.f32.mxu0 %vm1865_vm4, %v1863_v7 }
 0x1ba   :  { %1558 = vmatprep.subr.bf16.mxu0 %v1864_v54 }
 0x1bd   :  { %1560 = vmatpush3.bf16.msra.mxu0 %v1559_v57 }
 0x1be   :  { %1561 = vmatprep.subr.bf16.mxu0 %v1864_v54 }
 0x1c1   :  { %1563 = vmatpush3.bf16.msra.mxu0 %v1562_v60 }
 0x1c2   :  { %1564 = vmatprep.subr.bf16.mxu0 %v1864_v54 }
 0x1c5   :  { %1566 = vmatpush3.bf16.msra.mxu0 %v1565_v63 }
 0x1c6   :  { %1567 = vmatprep.subr.bf16.mxu0 %v1864_v54 }
 0x1c9   :  { %1569 = vmatpush3.bf16.msra.mxu0 %v1568_v2 }
 0x1ca   :  { %1570 = vmatprep.subr.bf16.mxu0 %v1864_v54 }
 0x1cd   :  { %1572 = vmatpush3.bf16.msra.mxu0 %v1571_v5 }
 0x1ce   :  { %1573 = vmatprep.subr.bf16.mxu0 %v1864_v54 }
 0x1d1   :  { %1575 = vmatpush3.bf16.msra.mxu0 %v1574_v9 }
 0x1d2   :  { %1576 = vmatprep.subr.bf16.mxu0 %v1864_v54 }
 0x1d5   :  { %1578 = vmatpush3.bf16.msra.mxu0 %v1577_v12 }
 0x28b   :  { %v967_v19 = vpop.f32.mrb[2].mxu0  ;;  %v1038_v22 = vpop.f32.mrb[2].mxu1 }
 0x28c   :  { %v1066_v23 = vadd.f32 %v1049_v14, %v967_v19  ;;  %v969_v24 = vpop.f32.mrb[3].mxu0  ;;  %v1040_v25 = vpop.f32.mrb[3].mxu1  ;;  %v1068_v7 = vadd.f32 %v1057_v16, %v1038_v22 }
 0x28d   :  { %v1067_v26 = vadd.f32 %v1053_v15, %v969_v24  ;;  %v1069_v18 = vadd.f32 %v1061_v27, %v1040_v25 }
 0x28e   :  { %1616 = vtanh.f32 %v1066_v23 }
 0x28f   :  { %1618 = vtanh.f32 %v1067_v26 }
 0x290   :  { %1620 = vtanh.f32 %v1068_v7 }
 0x291   :  { %1622 = vtanh.f32 %v1069_v18 }
 0x298   :  { %v1617_v28 = vpop.eup %1616 }
 0x299   :  { %v1074_v29 = vadd.f32 1.0, %v1617_v28  ;;  %v1619_v20 = vpop.eup %1618 }
 0x29a   :  { %v1076_v31 = vadd.f32 1.0, %v1619_v20  ;;  %v1621_v21 = vpop.eup %1620 }
 0x29b   :  { %v1075_v30 = vmul.f32 0.5, %v1074_v29  ;;  %v1623_v38 = vpop.eup %1622 }
 0x29c   :  { %v1077_v34 = vmul.f32 0.5, %v1076_v31  ;;  %v1078_v39 = vadd.f32 1.0, %v1623_v38 }
 0x29d   :  { %v1081_v35 = vmul.f32 %v1621_v21, %v1075_v30 }
 0x29e   :  { %v1080_v36 = vmul.f32 %v1077_v34, %v628_v33  ;;  %v1079_v40 = vmul.f32 0.5, %v1078_v39 }
 0x2a0   :  { %v1082_v37 = vadd.f32 %v1081_v35, %v1080_v36 }
 0x2a2   :  { %1624 = vtanh.f32 %v1082_v37  ;;  %1088 = vst [vmem:[#allocation18 + $0x8] sm:$0xff] %v1082_v37 }
 0x2ac   :  { %v1625_v17 = vpop.eup %1624 }
 0x2ad   :  { %v1084_v32 = vmul.f32 %v1625_v17, %v1079_v40 }
 0x2af   :  { %1086 = vst [vmem:[#allocation16 + $0x8] sm:$0xff] %v1084_v32  ;;  %1297 = vmatmul.mubr.f32.vlgmr.msra.gmra.mrb[4].mxu0 %v1084_v32 }
 0x2b0   :  { %1779 = shalt.err (!%p1776_p13)
}
 0x2b1   :  { %s1780_s2 = scalar_lea.hbm %s2142_s10, 256 }
 0x2b2   :  { %p1781_p0 = scmp.ne.s32.totalorder %s2142_s10, %s1780_s2  ;;  %p1784_p1 = scmp.lt.u32.totalorder %s1780_s2, %s2142_s10 }
 0x2b4   :  { %p1786_p2 = pnand %p1784_p1, %p1781_p0 }
 0x2b6   :  { %1789 = shalt.err (!%p1786_p2)
}
 0x2b7   :  { %1204 = dma.vmem_to_hbm [thread:$0]  %s1199_s12, 256, %s2142_s10, [#allocation17], %s1852_s29, %s1852_s29, %s1853_s30  }
 0x2b8   :  { %s1867_s1 = smov [#allocation18]  }
 0x2b9   :  { %s1210_s7 = sshll.u32 %s1867_s1, 4  ;;  %s1211_s7 = int_to_ptr.vmem [resolvable:$true] %s1210_s7 }
 0x2ba   :  { %s1790_s18 = scalar_lea.vmem %s1211_s7, 256  ;;  %p1795_p4 = scmp.lt.s32.totalorder %s1211_s7, %s1211_s7 }
 0x2bb   :  { %p1791_p3 = scmp.ne.s32.totalorder %s1211_s7, %s1790_s18  ;;  %p1796_p5 = scmp.lt.s32.totalorder %s1790_s18, %s1790_s18 }
 0x2bd   :  { %p1797_p6 = por %p1796_p5, %p1795_p4 }
 0x2bf   :  { %p1798_p7 = pnand %p1797_p6, %p1791_p3 }
 0x2c1   :  { %1801 = shalt.err (!%p1798_p7)
}
 0x2c2   :  { %s1802_s16 = scalar_lea.hbm %s2143_s11, 256 }
 0x2c3   :  { %p1803_p8 = scmp.ne.s32.totalorder %s2143_s11, %s1802_s16  ;;  %p1806_p9 = scmp.lt.u32.totalorder %s1802_s16, %s2143_s11 }
 0x2c5   :  { %p1808_p10 = pnand %p1806_p9, %p1803_p8 }
 0x2c7   :  { %1811 = shalt.err (!%p1808_p10)
}
 0x2c8   :  { %1216 = dma.vmem_to_hbm [thread:$0]  %s1211_s7, 256, %s2143_s11, [#allocation17], %s1852_s29, %s1852_s29, %s1853_s30  }
 0x2c9   :  { %v1246_v41 = vld [vmem:[%s2140_s8] ss:$0 sm:$0xff]  ;;  %s1868_s6 = smov [#allocation15]  }
 0x2ca   :  { %s1189_s12 = sshll.u32 %s1868_s6, 4  ;;  %s1190_s12 = int_to_ptr.vmem [resolvable:$true] %s1189_s12 }
 0x2cb   :  { %s1812_s20 = scalar_lea.vmem %s1190_s12, 128  ;;  %p1817_p12 = scmp.lt.s32.totalorder %s1190_s12, %s1190_s12 }
 0x2cc   :  { %p1813_p11 = scmp.ne.s32.totalorder %s1190_s12, %s1812_s20  ;;  %p1818_p13 = scmp.lt.s32.totalorder %s1812_s20, %s1812_s20 }
 0x2ce   :  { %p1819_p0 = por %p1818_p13, %p1817_p12 }
 0x2d0   :  { %p1820_p1 = pnand %p1819_p0, %p1813_p11 }
 0x382   :  { %v1178_v42 = vpop.f32.mrb[4].mxu0 }
 0x383   :  { %v1179_v43 = vadd.f32 %v1246_v41, %v1178_v42  ;;  %v1298_v44 = vpop.f32.mrb[5].mxu0 }
 0x385   :  { %1182 = vst [vmem:[#allocation15] sm:$0xff] %v1179_v43 }
 0x386   :  { %1823 = shalt.err (!%p1820_p1)
}
 0x387   :  { %s1824_s29 = scalar_lea.hbm %s2141_s9, 128 }
 0x388   :  { %p1825_p2 = scmp.ne.s32.totalorder %s2141_s9, %s1824_s29  ;;  %p1828_p3 = scmp.lt.u32.totalorder %s1824_s29, %s2141_s9 }
 0x38a   :  { %p1830_p4 = pnand %p1828_p3, %p1825_p2 }
 0x38c   :  { %1833 = shalt.err (!%p1830_p4)
}
 0x38d   :  { %1192 = dma.vmem_to_hbm [thread:$0]  %s1190_s12, 128, %s2141_s9, [#allocation4]  }
 0x38e   :  { %1846 = dma.done.wait [#allocation4], 128  }
 0x38f   :  { %1847 = vsyncadd [#allocation4], 4294967168 }
 0x390   :  { %1848 = dma.done.wait [#allocation17], 512  }
 0x391   :  { %1849 = vsyncadd [#allocation17], 4294966784 }
 0x392   :  { %1226 = vsyncpa [#allocation3], 1 }
 0x393   :  { %1227 = vsyncpa [#allocation7], 1 }
 0x394   :  { %1228 = vsyncpa [#allocation11], 1 }
 0x395   :  { %1229 = vsyncpa [#allocation14], 1 }
 0x396   :  { %1230 = vsyncpa [#allocation4], 1 }
 0x397   :  { %1231 = vsyncpa [#allocation17], 1 }
 0x398   :  { %1232 = vsyncpa [#allocation5], 1 }

</bundles_post_ra>
